<compile_context>
chip_gen: v7x
topology: tpu7x:2x2x1
jax: 0.10.0
libtpu: 0.0.40
codegen_flags: <defaults>
</compile_context>

<pallas_src>
import functools

import jax
import jax.numpy as jnp
from jax.experimental import pallas as pl
from jax.experimental.pallas import tpu as pltpu

_IN_FEATS = 794          # 784 image + 10 label
_IN_PAD = 896            # 794 rounded up to a multiple of 128 (lane-dense K)


def _round_up(n, m):
    return ((n + m - 1) // m) * m


def _cencoder_kernel(xy_ref, eps_ref,
                     w1, b1, w2, b2, w3, b3, w4, b4, w5, b5, w6, b6,
                     wh, bh, out_ref):
    bf16 = jnp.bfloat16
    f32 = jnp.float32

    xy = xy_ref[...]                                         # bf16 (TM, 896)

    # Linear(794->512) (zero-padded to K=896), + ReLU.  Dropout = identity (eval).
    h = jnp.dot(xy, w1[...], preferred_element_type=f32) + b1[...]
    h = jnp.maximum(h, 0.0)

    # Linear(512->512) with eval BatchNorm1d(512) folded in, + ReLU.
    h = jnp.dot(h.astype(bf16), w2[...], preferred_element_type=f32) + b2[...]
    h = jnp.maximum(h, 0.0)

    # Linear(512->256) + ReLU.
    h = jnp.dot(h.astype(bf16), w3[...], preferred_element_type=f32) + b3[...]
    h = jnp.maximum(h, 0.0)

    # Linear(256->256) with BN folded, + ReLU.
    h = jnp.dot(h.astype(bf16), w4[...], preferred_element_type=f32) + b4[...]
    h = jnp.maximum(h, 0.0)

    # Linear(256->128) + ReLU.
    h = jnp.dot(h.astype(bf16), w5[...], preferred_element_type=f32) + b5[...]
    h = jnp.maximum(h, 0.0)

    # Linear(128->128) with BN folded, + Sigmoid.
    h = jnp.dot(h.astype(bf16), w6[...], preferred_element_type=f32) + b6[...]
    h = jax.nn.sigmoid(h)

    # Fused, lane-padded mean/variance head: one (128, 2*OUT_W) matmul.
    #   res[:, :OUT_W] = [ m | m | v | 0.. ]   (m in the z slot, then m, then v)
    #   res[:, OUT_W:] = [ v | 0 .......... ]  (logvar aligned with the z slot)
    # eps_ref is zero outside the z slot, so one f32 elementwise pass produces
    # the packed lane-dense slab [ z | m | v | 0.. ] -> single unmasked store.
    res = jnp.dot(h.astype(bf16), wh[...], preferred_element_type=f32) + bh[...]
    half = eps_ref.shape[-1]                                 # = OUT_W (128-aligned)
    a = res[:, :half]
    vz = res[:, half:]
    out_ref[...] = a + eps_ref[...] * jnp.exp(0.5 * vz)


def _linear_params(key, fan_in, fan_out):
    """PyTorch-style nn.Linear default init; weight returned as [in, out]."""
    kw, kb = jax.random.split(key)
    bound = 1.0 / jnp.sqrt(jnp.float32(fan_in))
    w = jax.random.uniform(kw, (fan_in, fan_out), jnp.float32, -bound, bound)
    b = jax.random.uniform(kb, (1, fan_out), jnp.float32, -bound, bound)
    return w, b


def _bn_scale_shift(key, num_features, eps=1e-5):
    """Eval-mode BatchNorm1d as per-feature scale/shift (deterministic)."""
    kg, kb, km, kv = jax.random.split(key, 4)
    gamma = 1.0 + 0.05 * jax.random.normal(kg, (1, num_features), jnp.float32)
    beta = 0.05 * jax.random.normal(kb, (1, num_features), jnp.float32)
    run_mean = 0.05 * jax.random.normal(km, (1, num_features), jnp.float32)
    run_var = 1.0 + 0.05 * jnp.abs(jax.random.normal(kv, (1, num_features), jnp.float32))
    scale = gamma / jnp.sqrt(run_var + eps)
    shift = beta - run_mean * scale
    return scale, shift


def make_cencoder_params(key, z_dim):
    """Kernel-ready params: BN folded, head fused + lane-padded, weights bf16."""
    out_w = max(128, _round_up(3 * z_dim, 128))
    keys = jax.random.split(key, 11)
    w1, b1 = _linear_params(keys[0], _IN_FEATS, 512)
    w2, b2 = _linear_params(keys[1], 512, 512)
    s2, sh2 = _bn_scale_shift(keys[2], 512)
    w3, b3 = _linear_params(keys[3], 512, 256)
    w4, b4 = _linear_params(keys[4], 256, 256)
    s4, sh4 = _bn_scale_shift(keys[5], 256)
    w5, b5 = _linear_params(keys[6], 256, 128)
    w6, b6 = _linear_params(keys[7], 128, 128)
    s6, sh6 = _bn_scale_shift(keys[8], 128)
    wm, bm = _linear_params(keys[9], 128, z_dim)
    wv, bv = _linear_params(keys[10], 128, z_dim)

    # Fold eval-mode BN into the preceding Linear: W' = W*scale, b' = b*scale+shift.
    w2f, b2f = w2 * s2, b2 * s2 + sh2
    w4f, b4f = w4 * s4, b4 * s4 + sh4
    w6f, b6f = w6 * s6, b6 * s6 + sh6

    # Zero-pad Linear(794,512) to lane-dense K=896 (input is zero-padded too).
    w1p = jnp.zeros((_IN_PAD, 512), jnp.float32).at[:_IN_FEATS].set(w1)

    # Fused, lane-padded mean/variance head (see kernel comment).
    wh = jnp.zeros((128, 2 * out_w), jnp.float32)
    wh = wh.at[:, 0:z_dim].set(wm)
    wh = wh.at[:, z_dim:2 * z_dim].set(wm)
    wh = wh.at[:, 2 * z_dim:3 * z_dim].set(wv)
    wh = wh.at[:, out_w:out_w + z_dim].set(wv)
    bh = jnp.zeros((1, 2 * out_w), jnp.float32)
    bh = bh.at[:, 0:z_dim].set(bm)
    bh = bh.at[:, z_dim:2 * z_dim].set(bm)
    bh = bh.at[:, 2 * z_dim:3 * z_dim].set(bv)
    bh = bh.at[:, out_w:out_w + z_dim].set(bv)

    bf16 = jnp.bfloat16
    return (
        w1p.astype(bf16), b1,
        w2f.astype(bf16), b2f,
        w3.astype(bf16), b3,
        w4f.astype(bf16), b4f,
        w5.astype(bf16), b5,
        w6f.astype(bf16), b6f,
        wh.astype(bf16), bh,
    )


@functools.partial(jax.jit, static_argnames=("z_dim",))
def cencoder_forward(x, y, params, eps_noise, *, z_dim):
    B = x.shape[0]
    out_w = max(128, _round_up(3 * z_dim, 128))

    # Concat + lane-pad the input; activations travel as bf16 (halves input DMA).
    xy = jnp.concatenate([x.astype(jnp.float32), y.astype(jnp.float32)], axis=-1)
    xy = jnp.pad(xy, ((0, 0), (0, _IN_PAD - _IN_FEATS))).astype(jnp.bfloat16)
    # eps padded into the z slot of the lane-dense output layout; zeros elsewhere.
    eps = jnp.pad(eps_noise.astype(jnp.float32), ((0, 0), (0, out_w - z_dim)))

    # Batch tile: big tiles amortize the ~0.35us per-step overhead (v5e/v6e);
    # keep >=2 grid steps when the batch allows so "parallel" shards over the
    # two TensorCores on v7x.  VMEM is not a constraint (~2 MB weights).
    if B >= 16:
        TM = min(512, _round_up((B + 1) // 2, 8))
    else:
        TM = _round_up(max(B, 1), 8)
    B_pad = _round_up(B, TM)
    if B_pad != B:
        xy = jnp.pad(xy, ((0, B_pad - B), (0, 0)))
        eps = jnp.pad(eps, ((0, B_pad - B), (0, 0)))
    n_m = B_pad // TM

    def row_spec(feat):                      # activation blocks, tiled over batch
        return pl.BlockSpec((TM, feat), lambda i: (i, 0))

    def const_spec(p):                       # same block every step -> VMEM resident
        return pl.BlockSpec(p.shape, lambda i: (0, 0))

    in_specs = [row_spec(_IN_PAD), row_spec(out_w)] + [const_spec(p) for p in params]
    out_specs = pl.BlockSpec((TM, out_w), lambda i: (i, 0))

    # Advisory cost estimate (helps XLA overlap the custom call).
    flops_per_row = 2 * (_IN_PAD * 512 + 512 * 512 + 512 * 256 + 256 * 256
                         + 256 * 128 + 128 * 128 + 128 * 2 * out_w)
    param_bytes = sum(int(p.size) * p.dtype.itemsize for p in params)
    io_bytes = int(xy.size) * 2 + int(eps.size) * 4 + int(B_pad * out_w) * 4
    cost = pl.CostEstimate(
        flops=int(B_pad * flops_per_row),
        transcendentals=int(B_pad * (128 + out_w)),
        bytes_accessed=int(param_bytes + io_bytes),
    )

    out = pl.pallas_call(
        _cencoder_kernel,
        out_shape=jax.ShapeDtypeStruct((B_pad, out_w), jnp.float32),
        grid=(n_m,),
        in_specs=in_specs,
        out_specs=out_specs,
        compiler_params=pltpu.CompilerParams(
            dimension_semantics=("parallel",)),
        cost_estimate=cost,
    )(xy, eps, *params)

    z = out[:B, :z_dim]
    m = out[:B, z_dim:2 * z_dim]
    v = out[:B, 2 * z_dim:3 * z_dim]
    return z, m, v


def _reference_forward(x, y, params, eps, z_dim):
    """Pure-JAX f32 reference using the same (bf16-stored) params."""
    (w1, b1, w2, b2, w3, b3, w4, b4,
     w5, b5, w6, b6, wh, bh) = [p.astype(jnp.float32) for p in params]
    xy = jnp.concatenate([x, y], axis=-1).astype(jnp.float32)
    xy = jnp.pad(xy, ((0, 0), (0, _IN_PAD - _IN_FEATS)))
    xy = xy.astype(jnp.bfloat16).astype(jnp.float32)   # match kernel input quantization
    h = jnp.maximum(xy @ w1 + b1, 0.0)
    h = jnp.maximum(h @ w2 + b2, 0.0)
    h = jnp.maximum(h @ w3 + b3, 0.0)
    h = jnp.maximum(h @ w4 + b4, 0.0)
    h = jnp.maximum(h @ w5 + b5, 0.0)
    h = jax.nn.sigmoid(h @ w6 + b6)
    res = h @ wh + bh
    m = res[:, z_dim:2 * z_dim]
    v = res[:, 2 * z_dim:3 * z_dim]
    z = m + eps * jnp.exp(0.5 * v)
    return z, m, v


if __name__ == "__main__":
    key = jax.random.PRNGKey(0)
    k_x, k_y, k_params, k_eps = jax.random.split(key, 4)

    B = 8
    z_dim = 16

    # MNIST-flavored inputs: x is a flattened 28x28 image, y is a 10-way label.
    x = jax.random.normal(k_x, (B, 784), jnp.float32)
    y = jax.nn.one_hot(jax.random.randint(k_y, (B,), 0, 10), 10, dtype=jnp.float32)

    params = make_cencoder_params(k_params, z_dim)
    eps_noise = jax.random.normal(k_eps, (B, z_dim), jnp.float32)  # torch.randn_like(std)

    z, m, v = cencoder_forward(x, y, params, eps_noise, z_dim=z_dim)
    jax.block_until_ready((z, m, v))

    assert z.shape == (B, z_dim) and m.shape == (B, z_dim) and v.shape == (B, z_dim)
    assert bool(jnp.all(jnp.isfinite(z)) & jnp.all(jnp.isfinite(m)) & jnp.all(jnp.isfinite(v)))

    # Loose-tolerance check vs f32 reference (bf16 MXU inputs in the kernel).
    z_ref, m_ref, v_ref = _reference_forward(x, y, params, eps_noise, z_dim)
    for got, ref in ((z, z_ref), (m, m_ref), (v, v_ref)):
        assert float(jnp.max(jnp.abs(got - ref))) < 1e-1

    print("KERNEL_OK")
</pallas_src>

<mosaic_0001>
module attributes {stable_mosaic.version = 11 : i64} {
  func.func @_cencoder_kernel(%arg0: i32, %arg1: memref<8x896xbf16, #tpu.memory_space<vmem>>, %arg2: memref<8x128xf32, #tpu.memory_space<vmem>>, %arg3: memref<896x512xbf16, #tpu.memory_space<vmem>>, %arg4: memref<1x512xf32, #tpu.memory_space<vmem>>, %arg5: memref<512x512xbf16, #tpu.memory_space<vmem>>, %arg6: memref<1x512xf32, #tpu.memory_space<vmem>>, %arg7: memref<512x256xbf16, #tpu.memory_space<vmem>>, %arg8: memref<1x256xf32, #tpu.memory_space<vmem>>, %arg9: memref<256x256xbf16, #tpu.memory_space<vmem>>, %arg10: memref<1x256xf32, #tpu.memory_space<vmem>>, %arg11: memref<256x128xbf16, #tpu.memory_space<vmem>>, %arg12: memref<1x128xf32, #tpu.memory_space<vmem>>, %arg13: memref<128x128xbf16, #tpu.memory_space<vmem>>, %arg14: memref<1x128xf32, #tpu.memory_space<vmem>>, %arg15: memref<128x256xbf16, #tpu.memory_space<vmem>>, %arg16: memref<1x256xf32, #tpu.memory_space<vmem>>, %arg17: memref<8x128xf32, #tpu.memory_space<vmem>>) attributes {dimension_semantics = [#tpu.dimension_semantics<parallel>], iteration_bounds = array<i64: 1>, scalar_prefetch = 0 : i64, scratch_operands = 0 : i64, tpu.core_type = #tpu.core_type<tc>, window_params = [{transform_indices = @transform_0, window_bounds = array<i64: 8, 896>}, {transform_indices = @transform_1, window_bounds = array<i64: 8, 128>}, {pipeline_mode = #tpu.pipeline_mode<synchronous>, transform_indices = @transform_2, window_bounds = array<i64: 896, 512>}, {pipeline_mode = #tpu.pipeline_mode<synchronous>, transform_indices = @transform_3, window_bounds = array<i64: 1, 512>}, {pipeline_mode = #tpu.pipeline_mode<synchronous>, transform_indices = @transform_4, window_bounds = array<i64: 512, 512>}, {pipeline_mode = #tpu.pipeline_mode<synchronous>, transform_indices = @transform_5, window_bounds = array<i64: 1, 512>}, {pipeline_mode = #tpu.pipeline_mode<synchronous>, transform_indices = @transform_6, window_bounds = array<i64: 512, 256>}, {pipeline_mode = #tpu.pipeline_mode<synchronous>, transform_indices = @transform_7, window_bounds = array<i64: 1, 256>}, {pipeline_mode = #tpu.pipeline_mode<synchronous>, transform_indices = @transform_8, window_bounds = array<i64: 256, 256>}, {pipeline_mode = #tpu.pipeline_mode<synchronous>, transform_indices = @transform_9, window_bounds = array<i64: 1, 256>}, {pipeline_mode = #tpu.pipeline_mode<synchronous>, transform_indices = @transform_10, window_bounds = array<i64: 256, 128>}, {pipeline_mode = #tpu.pipeline_mode<synchronous>, transform_indices = @transform_11, window_bounds = array<i64: 1, 128>}, {pipeline_mode = #tpu.pipeline_mode<synchronous>, transform_indices = @transform_12, window_bounds = array<i64: 128, 128>}, {pipeline_mode = #tpu.pipeline_mode<synchronous>, transform_indices = @transform_13, window_bounds = array<i64: 1, 128>}, {pipeline_mode = #tpu.pipeline_mode<synchronous>, transform_indices = @transform_14, window_bounds = array<i64: 128, 256>}, {pipeline_mode = #tpu.pipeline_mode<synchronous>, transform_indices = @transform_15, window_bounds = array<i64: 1, 256>}, {transform_indices = @transform_16, window_bounds = array<i64: 8, 128>}]} {
    %c0 = arith.constant 0 : index
    %c0_0 = arith.constant 0 : index
    %0 = vector.load %arg1[%c0, %c0_0] : memref<8x896xbf16, #tpu.memory_space<vmem>>, vector<8x896xbf16>
    %c0_1 = arith.constant 0 : index
    %c0_2 = arith.constant 0 : index
    %1 = vector.load %arg3[%c0_1, %c0_2] : memref<896x512xbf16, #tpu.memory_space<vmem>>, vector<896x512xbf16>
    %cst = arith.constant dense<0.000000e+00> : vector<8x512xf32>
    %2 = tpu.matmul %0, %1, %cst {dimension_numbers = #tpu.dot_dimension_numbers<[1], [0], [0], [1], [0, 0, 1, 1], [], []>} : vector<8x896xbf16>, vector<896x512xbf16>, vector<8x512xf32> -> vector<8x512xf32>
    %c0_3 = arith.constant 0 : index
    %c0_4 = arith.constant 0 : index
    %3 = vector.load %arg4[%c0_3, %c0_4] : memref<1x512xf32, #tpu.memory_space<vmem>>, vector<1x512xf32>
    %4 = vector.broadcast %3 : vector<1x512xf32> to vector<8x512xf32>
    %5 = arith.addf %2, %4 : vector<8x512xf32>
    %cst_5 = arith.constant 0.000000e+00 : f32
    %6 = vector.broadcast %cst_5 : f32 to vector<8x512xf32>
    %7 = arith.maximumf %5, %6 : vector<8x512xf32>
    %8 = arith.truncf %7 : vector<8x512xf32> to vector<8x512xbf16>
    %c0_6 = arith.constant 0 : index
    %c0_7 = arith.constant 0 : index
    %9 = vector.load %arg5[%c0_6, %c0_7] : memref<512x512xbf16, #tpu.memory_space<vmem>>, vector<512x512xbf16>
    %cst_8 = arith.constant dense<0.000000e+00> : vector<8x512xf32>
    %10 = tpu.matmul %8, %9, %cst_8 {dimension_numbers = #tpu.dot_dimension_numbers<[1], [0], [0], [1], [0, 0, 1, 1], [], []>} : vector<8x512xbf16>, vector<512x512xbf16>, vector<8x512xf32> -> vector<8x512xf32>
    %c0_9 = arith.constant 0 : index
    %c0_10 = arith.constant 0 : index
    %11 = vector.load %arg6[%c0_9, %c0_10] : memref<1x512xf32, #tpu.memory_space<vmem>>, vector<1x512xf32>
    %12 = vector.broadcast %11 : vector<1x512xf32> to vector<8x512xf32>
    %13 = arith.addf %10, %12 : vector<8x512xf32>
    %cst_11 = arith.constant 0.000000e+00 : f32
    %14 = vector.broadcast %cst_11 : f32 to vector<8x512xf32>
    %15 = arith.maximumf %13, %14 : vector<8x512xf32>
    %16 = arith.truncf %15 : vector<8x512xf32> to vector<8x512xbf16>
    %c0_12 = arith.constant 0 : index
    %c0_13 = arith.constant 0 : index
    %17 = vector.load %arg7[%c0_12, %c0_13] : memref<512x256xbf16, #tpu.memory_space<vmem>>, vector<512x256xbf16>
    %cst_14 = arith.constant dense<0.000000e+00> : vector<8x256xf32>
    %18 = tpu.matmul %16, %17, %cst_14 {dimension_numbers = #tpu.dot_dimension_numbers<[1], [0], [0], [1], [0, 0, 1, 1], [], []>} : vector<8x512xbf16>, vector<512x256xbf16>, vector<8x256xf32> -> vector<8x256xf32>
    %c0_15 = arith.constant 0 : index
    %c0_16 = arith.constant 0 : index
    %19 = vector.load %arg8[%c0_15, %c0_16] : memref<1x256xf32, #tpu.memory_space<vmem>>, vector<1x256xf32>
    %20 = vector.broadcast %19 : vector<1x256xf32> to vector<8x256xf32>
    %21 = arith.addf %18, %20 : vector<8x256xf32>
    %cst_17 = arith.constant 0.000000e+00 : f32
    %22 = vector.broadcast %cst_17 : f32 to vector<8x256xf32>
    %23 = arith.maximumf %21, %22 : vector<8x256xf32>
    %24 = arith.truncf %23 : vector<8x256xf32> to vector<8x256xbf16>
    %c0_18 = arith.constant 0 : index
    %c0_19 = arith.constant 0 : index
    %25 = vector.load %arg9[%c0_18, %c0_19] : memref<256x256xbf16, #tpu.memory_space<vmem>>, vector<256x256xbf16>
    %cst_20 = arith.constant dense<0.000000e+00> : vector<8x256xf32>
    %26 = tpu.matmul %24, %25, %cst_20 {dimension_numbers = #tpu.dot_dimension_numbers<[1], [0], [0], [1], [0, 0, 1, 1], [], []>} : vector<8x256xbf16>, vector<256x256xbf16>, vector<8x256xf32> -> vector<8x256xf32>
    %c0_21 = arith.constant 0 : index
    %c0_22 = arith.constant 0 : index
    %27 = vector.load %arg10[%c0_21, %c0_22] : memref<1x256xf32, #tpu.memory_space<vmem>>, vector<1x256xf32>
    %28 = vector.broadcast %27 : vector<1x256xf32> to vector<8x256xf32>
    %29 = arith.addf %26, %28 : vector<8x256xf32>
    %cst_23 = arith.constant 0.000000e+00 : f32
    %30 = vector.broadcast %cst_23 : f32 to vector<8x256xf32>
    %31 = arith.maximumf %29, %30 : vector<8x256xf32>
    %32 = arith.truncf %31 : vector<8x256xf32> to vector<8x256xbf16>
    %c0_24 = arith.constant 0 : index
    %c0_25 = arith.constant 0 : index
    %33 = vector.load %arg11[%c0_24, %c0_25] : memref<256x128xbf16, #tpu.memory_space<vmem>>, vector<256x128xbf16>
    %cst_26 = arith.constant dense<0.000000e+00> : vector<8x128xf32>
    %34 = tpu.matmul %32, %33, %cst_26 {dimension_numbers = #tpu.dot_dimension_numbers<[1], [0], [0], [1], [0, 0, 1, 1], [], []>} : vector<8x256xbf16>, vector<256x128xbf16>, vector<8x128xf32> -> vector<8x128xf32>
    %c0_27 = arith.constant 0 : index
    %c0_28 = arith.constant 0 : index
    %35 = vector.load %arg12[%c0_27, %c0_28] : memref<1x128xf32, #tpu.memory_space<vmem>>, vector<1x128xf32>
    %36 = vector.broadcast %35 : vector<1x128xf32> to vector<8x128xf32>
    %37 = arith.addf %34, %36 : vector<8x128xf32>
    %cst_29 = arith.constant 0.000000e+00 : f32
    %38 = vector.broadcast %cst_29 : f32 to vector<8x128xf32>
    %39 = arith.maximumf %37, %38 : vector<8x128xf32>
    %40 = arith.truncf %39 : vector<8x128xf32> to vector<8x128xbf16>
    %c0_30 = arith.constant 0 : index
    %c0_31 = arith.constant 0 : index
    %41 = vector.load %arg13[%c0_30, %c0_31] : memref<128x128xbf16, #tpu.memory_space<vmem>>, vector<128x128xbf16>
    %cst_32 = arith.constant dense<0.000000e+00> : vector<8x128xf32>
    %42 = tpu.matmul %40, %41, %cst_32 {dimension_numbers = #tpu.dot_dimension_numbers<[1], [0], [0], [1], [0, 0, 1, 1], [], []>} : vector<8x128xbf16>, vector<128x128xbf16>, vector<8x128xf32> -> vector<8x128xf32>
    %c0_33 = arith.constant 0 : index
    %c0_34 = arith.constant 0 : index
    %43 = vector.load %arg14[%c0_33, %c0_34] : memref<1x128xf32, #tpu.memory_space<vmem>>, vector<1x128xf32>
    %44 = vector.broadcast %43 : vector<1x128xf32> to vector<8x128xf32>
    %45 = arith.addf %42, %44 : vector<8x128xf32>
    %46 = arith.negf %45 : vector<8x128xf32>
    %47 = math.exp %46 : vector<8x128xf32>
    %cst_35 = arith.constant 1.000000e+00 : f32
    %48 = vector.broadcast %cst_35 : f32 to vector<8x128xf32>
    %49 = arith.addf %48, %47 : vector<8x128xf32>
    %50 = arith.divf %48, %49 : vector<8x128xf32>
    %51 = arith.truncf %50 : vector<8x128xf32> to vector<8x128xbf16>
    %c0_36 = arith.constant 0 : index
    %c0_37 = arith.constant 0 : index
    %52 = vector.load %arg15[%c0_36, %c0_37] : memref<128x256xbf16, #tpu.memory_space<vmem>>, vector<128x256xbf16>
    %cst_38 = arith.constant dense<0.000000e+00> : vector<8x256xf32>
    %53 = tpu.matmul %51, %52, %cst_38 {dimension_numbers = #tpu.dot_dimension_numbers<[1], [0], [0], [1], [0, 0, 1, 1], [], []>} : vector<8x128xbf16>, vector<128x256xbf16>, vector<8x256xf32> -> vector<8x256xf32>
    %c0_39 = arith.constant 0 : index
    %c0_40 = arith.constant 0 : index
    %54 = vector.load %arg16[%c0_39, %c0_40] : memref<1x256xf32, #tpu.memory_space<vmem>>, vector<1x256xf32>
    %55 = vector.broadcast %54 : vector<1x256xf32> to vector<8x256xf32>
    %56 = arith.addf %53, %55 : vector<8x256xf32>
    %57 = vector.extract_strided_slice %56 {offsets = [0, 0], sizes = [8, 128], strides = [1, 1]} : vector<8x256xf32> to vector<8x128xf32>
    %58 = vector.extract_strided_slice %56 {offsets = [0, 128], sizes = [8, 128], strides = [1, 1]} : vector<8x256xf32> to vector<8x128xf32>
    %c0_41 = arith.constant 0 : index
    %c0_42 = arith.constant 0 : index
    %59 = vector.load %arg2[%c0_41, %c0_42] : memref<8x128xf32, #tpu.memory_space<vmem>>, vector<8x128xf32>
    %cst_43 = arith.constant 5.000000e-01 : f32
    %60 = vector.broadcast %cst_43 : f32 to vector<8x128xf32>
    %61 = arith.mulf %60, %58 : vector<8x128xf32>
    %62 = math.exp %61 : vector<8x128xf32>
    %63 = arith.mulf %59, %62 : vector<8x128xf32>
    %64 = arith.addf %57, %63 : vector<8x128xf32>
    %c0_44 = arith.constant 0 : index
    %c0_45 = arith.constant 0 : index
    %65 = vector.load %arg17[%c0_44, %c0_45] : memref<8x128xf32, #tpu.memory_space<vmem>>, vector<8x128xf32>
    tpu.vector_store %arg17[%c0_44, %c0_45], %64 {strides = array<i32>} : memref<8x128xf32, #tpu.memory_space<vmem>>, vector<8x128xf32>,
    return
  }
  func.func @transform_0(%arg0: i32) -> (i32, i32) {
    %c0_i32 = arith.constant 0 : i32
    %c0_i32_0 = arith.constant 0 : i32
    return %arg0, %c0_i32 : i32, i32
  }
  func.func @transform_1(%arg0: i32) -> (i32, i32) {
    %c0_i32 = arith.constant 0 : i32
    %c0_i32_0 = arith.constant 0 : i32
    return %arg0, %c0_i32 : i32, i32
  }
  func.func @transform_2(%arg0: i32) -> (i32, i32) {
    %c0_i32 = arith.constant 0 : i32
    %c0_i32_0 = arith.constant 0 : i32
    %c0_i32_1 = arith.constant 0 : i32
    return %c0_i32, %c0_i32_0 : i32, i32
  }
  func.func @transform_3(%arg0: i32) -> (i32, i32) {
    %c0_i32 = arith.constant 0 : i32
    %c0_i32_0 = arith.constant 0 : i32
    %c0_i32_1 = arith.constant 0 : i32
    return %c0_i32, %c0_i32_0 : i32, i32
  }
  func.func @transform_4(%arg0: i32) -> (i32, i32) {
    %c0_i32 = arith.constant 0 : i32
    %c0_i32_0 = arith.constant 0 : i32
    %c0_i32_1 = arith.constant 0 : i32
    return %c0_i32, %c0_i32_0 : i32, i32
  }
  func.func @transform_5(%arg0: i32) -> (i32, i32) {
    %c0_i32 = arith.constant 0 : i32
    %c0_i32_0 = arith.constant 0 : i32
    %c0_i32_1 = arith.constant 0 : i32
    return %c0_i32, %c0_i32_0 : i32, i32
  }
  func.func @transform_6(%arg0: i32) -> (i32, i32) {
    %c0_i32 = arith.constant 0 : i32
    %c0_i32_0 = arith.constant 0 : i32
    %c0_i32_1 = arith.constant 0 : i32
    return %c0_i32, %c0_i32_0 : i32, i32
  }
  func.func @transform_7(%arg0: i32) -> (i32, i32) {
    %c0_i32 = arith.constant 0 : i32
    %c0_i32_0 = arith.constant 0 : i32
    %c0_i32_1 = arith.constant 0 : i32
    return %c0_i32, %c0_i32_0 : i32, i32
  }
  func.func @transform_8(%arg0: i32) -> (i32, i32) {
    %c0_i32 = arith.constant 0 : i32
    %c0_i32_0 = arith.constant 0 : i32
    %c0_i32_1 = arith.constant 0 : i32
    return %c0_i32, %c0_i32_0 : i32, i32
  }
  func.func @transform_9(%arg0: i32) -> (i32, i32) {
    %c0_i32 = arith.constant 0 : i32
    %c0_i32_0 = arith.constant 0 : i32
    %c0_i32_1 = arith.constant 0 : i32
    return %c0_i32, %c0_i32_0 : i32, i32
  }
  func.func @transform_10(%arg0: i32) -> (i32, i32) {
    %c0_i32 = arith.constant 0 : i32
    %c0_i32_0 = arith.constant 0 : i32
    %c0_i32_1 = arith.constant 0 : i32
    return %c0_i32, %c0_i32_0 : i32, i32
  }
  func.func @transform_11(%arg0: i32) -> (i32, i32) {
    %c0_i32 = arith.constant 0 : i32
    %c0_i32_0 = arith.constant 0 : i32
    %c0_i32_1 = arith.constant 0 : i32
    return %c0_i32, %c0_i32_0 : i32, i32
  }
  func.func @transform_12(%arg0: i32) -> (i32, i32) {
    %c0_i32 = arith.constant 0 : i32
    %c0_i32_0 = arith.constant 0 : i32
    %c0_i32_1 = arith.constant 0 : i32
    return %c0_i32, %c0_i32_0 : i32, i32
  }
  func.func @transform_13(%arg0: i32) -> (i32, i32) {
    %c0_i32 = arith.constant 0 : i32
    %c0_i32_0 = arith.constant 0 : i32
    %c0_i32_1 = arith.constant 0 : i32
    return %c0_i32, %c0_i32_0 : i32, i32
  }
  func.func @transform_14(%arg0: i32) -> (i32, i32) {
    %c0_i32 = arith.constant 0 : i32
    %c0_i32_0 = arith.constant 0 : i32
    %c0_i32_1 = arith.constant 0 : i32
    return %c0_i32, %c0_i32_0 : i32, i32
  }
  func.func @transform_15(%arg0: i32) -> (i32, i32) {
    %c0_i32 = arith.constant 0 : i32
    %c0_i32_0 = arith.constant 0 : i32
    %c0_i32_1 = arith.constant 0 : i32
    return %c0_i32, %c0_i32_0 : i32, i32
  }
  func.func @transform_16(%arg0: i32) -> (i32, i32) {
    %c0_i32 = arith.constant 0 : i32
    %c0_i32_0 = arith.constant 0 : i32
    return %arg0, %c0_i32 : i32, i32
  }
}

</mosaic_0001>

<bundles_post_ra>
// kernel: cencoder_forward.1
= control target key start
LH: loop header
LB: loop body
LE: loop exit
PB: predicated region body
PF: predicated region fallthrough
CT: control target
= control target key end

     0   :  { %s6038_s0 = inlined_call_operand.vmem [shape: bf16[8,896], index: 0, kind: input, shape index: {}]   ;;  %s6039_s1 = inlined_call_operand.vmem [shape: f32[8,128], index: 1, kind: input, shape index: {}]   ;;  %s6040_s2 = inlined_call_operand.hbm [shape: bf16[896,512], index: 2, kind: input, shape index: {}]   ;;  %s6041_s3 = inlined_call_operand.hbm [shape: f32[1,512], index: 3, kind: input, shape index: {}]   ;;  %s6042_s4 = inlined_call_operand.hbm [shape: bf16[512,512], index: 4, kind: input, shape index: {}]   ;;  %s6043_s5 = inlined_call_operand.hbm [shape: f32[1,512], index: 5, kind: input, shape index: {}]   ;;  %s6044_s6 = inlined_call_operand.hbm [shape: bf16[512,256], index: 6, kind: input, shape index: {}]   ;;  %s6045_s7 = inlined_call_operand.vmem [shape: f32[1,256], index: 7, kind: input, shape index: {}]   ;;  %s6046_s8 = inlined_call_operand.hbm [shape: bf16[256,256], index: 8, kind: input, shape index: {}]   ;;  %s6047_s9 = inlined_call_operand.hbm [shape: f32[1,256], index: 9, kind: input, shape index: {}]   ;;  %s6048_s10 = inlined_call_operand.vmem [shape: bf16[256,128], index: 10, kind: input, shape index: {}]   ;;  %s6049_s11 = inlined_call_operand.hbm [shape: f32[1,128], index: 11, kind: input, shape index: {}]   ;;  %s6050_s12 = inlined_call_operand.vmem [shape: bf16[128,128], index: 12, kind: input, shape index: {}]   ;;  %s6051_s13 = inlined_call_operand.vmem [shape: f32[1,128], index: 13, kind: input, shape index: {}]   ;;  %s6052_s14 = inlined_call_operand.hbm [shape: bf16[128,256], index: 14, kind: input, shape index: {}]   ;;  %s6053_s15 = inlined_call_operand.hbm [shape: f32[1,256], index: 15, kind: input, shape index: {}]   ;;  %s6054_s16 = inlined_call_operand.vmem [shape: f32[8,128], index: 16, kind: output, shape index: {}]  }
   0x1   :  { %6056 = sst [smem:[#allocation24_spill]] %s6038_s0 }
   0x2   :  { %21 = vsyncpa [#allocation3], 0 }
   0x3   :  { %22 = vsyncpa [#allocation5], 0 }
   0x4   :  { %23 = vsyncpa [#allocation8], 0 }
   0x5   :  { %24 = vsyncpa [#allocation11], 0 }
   0x6   :  { %25 = vsyncpa [#allocation14], 0 }
   0x7   :  { %26 = vsyncpa [#allocation17], 0  ;;  %s5642_s21 = smov [#allocation4]   ;;  %s5643_s23 = smov [#allocation7]  }
   0x8   :  { %s49_s22 = sshll.u32 %s5642_s21, 4  ;;  %s71_s24 = sshll.u32 %s5643_s23, 4  ;;  %s50_s22 = int_to_ptr.vmem [resolvable:$true] %s49_s22  ;;  %s72_s24 = int_to_ptr.vmem [resolvable:$true] %s71_s24 }
   0x9   :  { %s5410_s27 = scalar_lea.hbm %s6041_s3, 64 }
   0xa   :  { %p5411_p0 = scmp.ne.s32.totalorder %s6041_s3, %s5410_s27  ;;  %p5414_p1 = scmp.lt.u32.totalorder %s5410_s27, %s6041_s3 }
   0xc   :  { %p5416_p2 = pnand %p5414_p1, %p5411_p0 }
   0xe   :  { %5419 = shalt.err (!%p5416_p2)
}
   0xf   :  { %s5420_s17 = scalar_lea.vmem %s50_s22, 64  ;;  %p5425_p4 = scmp.lt.s32.totalorder %s50_s22, %s50_s22 }
  0x10   :  { %p5421_p3 = scmp.ne.s32.totalorder %s50_s22, %s5420_s17  ;;  %p5426_p5 = scmp.lt.s32.totalorder %s5420_s17, %s5420_s17 }
  0x12   :  { %p5427_p6 = por %p5426_p5, %p5425_p4 }
  0x14   :  { %p5428_p7 = pnand %p5427_p6, %p5421_p3 }
  0x16   :  { %5431 = shalt.err (!%p5428_p7)
}
  0x17   :  { %52 = dma.hbm_to_vmem [thread:$0]  %s6041_s3, 64, %s50_s22, [#allocation5]  }
  0x18   :  { %s5432_s23 = scalar_lea.hbm %s6043_s5, 64 }
  0x19   :  { %p5433_p8 = scmp.ne.s32.totalorder %s6043_s5, %s5432_s23  ;;  %p5436_p9 = scmp.lt.u32.totalorder %s5432_s23, %s6043_s5 }
  0x1b   :  { %p5438_p10 = pnand %p5436_p9, %p5433_p8 }
  0x1d   :  { %5441 = shalt.err (!%p5438_p10)
}
  0x1e   :  { %s5442_s29 = scalar_lea.vmem %s72_s24, 64  ;;  %p5447_p12 = scmp.lt.s32.totalorder %s72_s24, %s72_s24 }
  0x1f   :  { %p5443_p11 = scmp.ne.s32.totalorder %s72_s24, %s5442_s29  ;;  %p5448_p13 = scmp.lt.s32.totalorder %s5442_s29, %s5442_s29 }
  0x21   :  { %p5449_p0 = por %p5448_p13, %p5447_p12 }
  0x23   :  { %p5450_p1 = pnand %p5449_p0, %p5443_p11 }
  0x25   :  { %5453 = shalt.err (!%p5450_p1)
}
  0x26   :  { %74 = dma.hbm_to_vmem [thread:$0]  %s6043_s5, 64, %s72_s24, [#allocation8]  }
  0x27   :  { %s5644_s30 = smov [#allocation10]   ;;  %s5645_s17 = smov [#allocation13]  }
  0x28   :  { %s94_s0 = sshll.u32 %s5644_s30, 4  ;;  %s119_s18 = sshll.u32 %s5645_s17, 4  ;;  %s95_s0 = int_to_ptr.vmem [resolvable:$true] %s94_s0  ;;  %s5768_s18 = int_to_ptr.vmem [resolvable:$true] %s119_s18 }
  0x29   :  { %s5454_s21 = scalar_lea.hbm %s6046_s8, 4096 }
  0x2a   :  { %p5455_p2 = scmp.ne.s32.totalorder %s6046_s8, %s5454_s21  ;;  %p5458_p3 = scmp.lt.u32.totalorder %s5454_s21, %s6046_s8 }
  0x2c   :  { %p5460_p4 = pnand %p5458_p3, %p5455_p2 }
  0x2e   :  { %5463 = shalt.err (!%p5460_p4)
}
  0x2f   :  { %s5464_s5 = scalar_lea.vmem %s95_s0, 4096  ;;  %p5469_p6 = scmp.lt.s32.totalorder %s95_s0, %s95_s0 }
  0x30   :  { %p5465_p5 = scmp.ne.s32.totalorder %s95_s0, %s5464_s5  ;;  %p5470_p7 = scmp.lt.s32.totalorder %s5464_s5, %s5464_s5 }
  0x32   :  { %p5471_p8 = por %p5470_p7, %p5469_p6 }
  0x34   :  { %p5472_p9 = pnand %p5471_p8, %p5465_p5 }
  0x36   :  { %5475 = shalt.err (!%p5472_p9)
}
  0x37   :  { %s5646_s24 = smov 128   ;;  %s5647_s28 = smov 8  }
  0x38   :  { %100 = dma.hbm_to_vmem [thread:$0]  %s6046_s8, 4096, %s95_s0, [#allocation11], %s5646_s24, %s5646_s24, %s5647_s28  }
  0x39   :  { %s5476_s17 = scalar_lea.hbm %s6049_s11, 16 }
  0x3a   :  { %p5477_p10 = scmp.ne.s32.totalorder %s6049_s11, %s5476_s17  ;;  %p5480_p11 = scmp.lt.u32.totalorder %s5476_s17, %s6049_s11 }
  0x3c   :  { %p5482_p12 = pnand %p5480_p11, %p5477_p10 }
  0x3e   :  { %5485 = shalt.err (!%p5482_p12)
}
  0x3f   :  { %s5486_s25 = scalar_lea.vmem %s5768_s18, 16  ;;  %s5490_s8 = scalar_lea.vmem %s5768_s18, 32 }
  0x40   :  { %p5487_p13 = scmp.ne.s32.totalorder %s5768_s18, %s5486_s25  ;;  %p5491_p0 = scmp.lt.s32.totalorder %s5768_s18, %s5768_s18 }
  0x41   :  { %p5492_p1 = scmp.lt.s32.totalorder %s5490_s8, %s5486_s25 }
  0x43   :  { %p5493_p2 = por %p5492_p1, %p5491_p0 }
  0x45   :  { %p5494_p3 = pnand %p5493_p2, %p5487_p13 }
  0x47   :  { %5497 = shalt.err (!%p5494_p3)
}
  0x48   :  { %122 = dma.hbm_to_vmem [thread:$0]  %s6049_s11, 16, %s5768_s18, [#allocation14]  }
  0x49   :  { %s5648_s27 = smov [#allocation2]   ;;  %s5498_s22 = scalar_lea.hbm %s6040_s2, 28672 }
  0x4a   :  { %s36_s5 = sshll.u32 %s5648_s27, 4  ;;  %p5499_p4 = scmp.ne.s32.totalorder %s6040_s2, %s5498_s22  ;;  %s37_s5 = int_to_ptr.vmem [resolvable:$true] %s36_s5 }
  0x4b   :  { %p5502_p5 = scmp.lt.u32.totalorder %s5498_s22, %s6040_s2 }
  0x4d   :  { %p5504_p6 = pnand %p5502_p5, %p5499_p4 }
  0x4f   :  { %5507 = shalt.err (!%p5504_p6)
}
  0x50   :  { %s5508_s21 = scalar_lea.vmem %s37_s5, 28672  ;;  %p5513_p8 = scmp.lt.s32.totalorder %s37_s5, %s37_s5 }
  0x51   :  { %p5509_p7 = scmp.ne.s32.totalorder %s37_s5, %s5508_s21  ;;  %p5514_p9 = scmp.lt.s32.totalorder %s5508_s21, %s5508_s21 }
  0x53   :  { %p5515_p10 = por %p5514_p9, %p5513_p8 }
  0x55   :  { %p5516_p11 = pnand %p5515_p10, %p5509_p7 }
  0x57   :  { %5519 = shalt.err (!%p5516_p11)
}
  0x58   :  { %s5649_s11 = smov 256   ;;  %s5650_s18 = smov 16  }
  0x59   :  { %42 = dma.hbm_to_vmem [thread:$0]  %s6040_s2, 28672, %s37_s5, [#allocation3], %s5649_s11, %s5649_s11, %s5650_s18  }
  0x5a   :  { %s5651_s8 = smov [#allocation6]   ;;  %s5652_s26 = smov [#allocation9]  }
  0x5b   :  { %s58_s0 = sshll.u32 %s5651_s8, 4  ;;  %s80_s27 = sshll.u32 %s5652_s26, 4  ;;  %s59_s0 = int_to_ptr.vmem [resolvable:$true] %s58_s0  ;;  %s81_s27 = int_to_ptr.vmem [resolvable:$true] %s80_s27 }
  0x5c   :  { %s5520_s22 = scalar_lea.hbm %s6042_s4, 16384 }
  0x5d   :  { %p5521_p12 = scmp.ne.s32.totalorder %s6042_s4, %s5520_s22  ;;  %p5524_p13 = scmp.lt.u32.totalorder %s5520_s22, %s6042_s4 }
  0x5f   :  { %p5526_p0 = pnand %p5524_p13, %p5521_p12 }
  0x61   :  { %5529 = shalt.err (!%p5526_p0)
}
  0x62   :  { %s5530_s2 = scalar_lea.vmem %s59_s0, 16384  ;;  %p5535_p2 = scmp.lt.s32.totalorder %s59_s0, %s59_s0 }
  0x63   :  { %p5531_p1 = scmp.ne.s32.totalorder %s59_s0, %s5530_s2  ;;  %p5536_p3 = scmp.lt.s32.totalorder %s5530_s2, %s5530_s2 }
  0x65   :  { %p5537_p4 = por %p5536_p3, %p5535_p2 }
  0x67   :  { %p5538_p5 = pnand %p5537_p4, %p5531_p1 }
  0x69   :  { %5541 = shalt.err (!%p5538_p5)
}
  0x6a   :  { %64 = dma.hbm_to_vmem [thread:$0]  %s6042_s4, 16384, %s59_s0, [#allocation5], %s5649_s11, %s5649_s11, %s5650_s18  }
  0x6b   :  { %s5542_s8 = scalar_lea.hbm %s6044_s6, 8192 }
  0x6c   :  { %p5543_p6 = scmp.ne.s32.totalorder %s6044_s6, %s5542_s8  ;;  %p5546_p7 = scmp.lt.u32.totalorder %s5542_s8, %s6044_s6 }
  0x6e   :  { %p5548_p8 = pnand %p5546_p7, %p5543_p6 }
  0x70   :  { %5551 = shalt.err (!%p5548_p8)
}
  0x71   :  { %s5552_s30 = scalar_lea.vmem %s81_s27, 8192  ;;  %p5557_p10 = scmp.lt.s32.totalorder %s81_s27, %s81_s27 }
  0x72   :  { %p5553_p9 = scmp.ne.s32.totalorder %s81_s27, %s5552_s30  ;;  %p5558_p11 = scmp.lt.s32.totalorder %s5552_s30, %s5552_s30 }
  0x74   :  { %p5559_p12 = por %p5558_p11, %p5557_p10 }
  0x76   :  { %p5560_p13 = pnand %p5559_p12, %p5553_p9 }
  0x78   :  { %5563 = shalt.err (!%p5560_p13)
}
  0x79   :  { %86 = dma.hbm_to_vmem [thread:$0]  %s6044_s6, 8192, %s81_s27, [#allocation8], %s5646_s24, %s5646_s24, %s5647_s28  }
  0x7a   :  { %s5653_s18 = smov [#allocation12]   ;;  %s5654_s17 = smov [#allocation15]  }
  0x7b   :  { %s107_s0 = sshll.u32 %s5653_s18, 4  ;;  %s132_s19 = sshll.u32 %s5654_s17, 4  ;;  %s108_s0 = int_to_ptr.vmem [resolvable:$true] %s107_s0  ;;  %s133_s19 = int_to_ptr.vmem [resolvable:$true] %s132_s19 }
  0x7c   :  { %s5564_s5 = scalar_lea.hbm %s6047_s9, 32 }
  0x7d   :  { %p5565_p0 = scmp.ne.s32.totalorder %s6047_s9, %s5564_s5  ;;  %p5568_p1 = scmp.lt.u32.totalorder %s5564_s5, %s6047_s9 }
  0x7f   :  { %p5570_p2 = pnand %p5568_p1, %p5565_p0 }
  0x81   :  { %5573 = shalt.err (!%p5570_p2)
}
  0x82   :  { %s5574_s6 = scalar_lea.vmem %s108_s0, 32  ;;  %p5579_p4 = scmp.lt.s32.totalorder %s108_s0, %s108_s0 }
  0x83   :  { %p5575_p3 = scmp.ne.s32.totalorder %s108_s0, %s5574_s6  ;;  %p5580_p5 = scmp.lt.s32.totalorder %s5574_s6, %s5574_s6 }
  0x85   :  { %p5581_p6 = por %p5580_p5, %p5579_p4 }
  0x87   :  { %p5582_p7 = pnand %p5581_p6, %p5575_p3 }
  0x89   :  { %5585 = shalt.err (!%p5582_p7)
}
  0x8a   :  { %110 = dma.hbm_to_vmem [thread:$0]  %s6047_s9, 32, %s108_s0, [#allocation11]  }
  0x8b   :  { %s5586_s22 = scalar_lea.hbm %s6052_s14, 2048 }
  0x8c   :  { %p5587_p8 = scmp.ne.s32.totalorder %s6052_s14, %s5586_s22  ;;  %p5590_p9 = scmp.lt.u32.totalorder %s5586_s22, %s6052_s14 }
  0x8e   :  { %p5592_p10 = pnand %p5590_p9, %p5587_p8 }
  0x90   :  { %5595 = shalt.err (!%p5592_p10)
}
  0x91   :  { %s5596_s17 = scalar_lea.vmem %s133_s19, 2048  ;;  %p5601_p12 = scmp.lt.s32.totalorder %s133_s19, %s133_s19 }
  0x92   :  { %p5597_p11 = scmp.ne.s32.totalorder %s133_s19, %s5596_s17  ;;  %p5602_p13 = scmp.lt.s32.totalorder %s5596_s17, %s5596_s17 }
  0x94   :  { %p5603_p0 = por %p5602_p13, %p5601_p12 }
  0x96   :  { %p5604_p1 = pnand %p5603_p0, %p5597_p11 }
  0x98   :  { %5607 = shalt.err (!%p5604_p1)
}
  0x99   :  { %138 = dma.hbm_to_vmem [thread:$0]  %s6052_s14, 2048, %s133_s19, [#allocation14], %s5646_s24, %s5646_s24, %s5647_s28  }
  0x9a   :  { %s5655_s20 = smov [#allocation16]   ;;  %s5608_s23 = scalar_lea.hbm %s6053_s15, 32 }
  0x9b   :  { %s145_s2 = sshll.u32 %s5655_s20, 4  ;;  %p5609_p2 = scmp.ne.s32.totalorder %s6053_s15, %s5608_s23  ;;  %s146_s2 = int_to_ptr.vmem [resolvable:$true] %s145_s2 }
  0x9c   :  { %p5612_p3 = scmp.lt.u32.totalorder %s5608_s23, %s6053_s15 }
  0x9e   :  { %p5614_p4 = pnand %p5612_p3, %p5609_p2 }
  0xa0   :  { %5617 = shalt.err (!%p5614_p4)
}
  0xa1   :  { %s5618_s26 = scalar_lea.vmem %s146_s2, 32  ;;  %p5623_p6 = scmp.lt.s32.totalorder %s146_s2, %s146_s2 }
  0xa2   :  { %p5619_p5 = scmp.ne.s32.totalorder %s146_s2, %s5618_s26  ;;  %p5624_p7 = scmp.lt.s32.totalorder %s5618_s26, %s5618_s26 }
  0xa4   :  { %p5625_p8 = por %p5624_p7, %p5623_p6 }
  0xa6   :  { %p5626_p9 = pnand %p5625_p8, %p5619_p5 }
  0xa8   :  { %5629 = shalt.err (!%p5626_p9)
}
  0xa9   :  { %148 = dma.hbm_to_vmem [thread:$0]  %s6053_s15, 32, %s146_s2, [#allocation17]  }
  0xaa   :  { %5630 = dma.done.wait [#allocation3], 28672  }
  0xab   :  { %5631 = vsyncadd [#allocation3], 4294938624 }
  0xac   :  { %5632 = dma.done.wait [#allocation5], 16448  }
  0xad   :  { %5633 = vsyncadd [#allocation5], 4294950848 }
  0xae   :  { %5634 = dma.done.wait [#allocation8], 8256  }
  0xaf   :  { %5635 = vsyncadd [#allocation8], 4294959040 }
  0xb0   :  { %5636 = dma.done.wait [#allocation11], 4128  }
  0xb1   :  { %5637 = vsyncadd [#allocation11], 4294963168 }
  0xb2   :  { %5638 = dma.done.wait [#allocation14], 2064  }
  0xb3   :  { %5639 = vsyncadd [#allocation14], 4294965232 }
  0xb4   :  { %5640 = dma.done.wait [#allocation17], 32  }
  0xb5   :  { %5641 = vsyncadd [#allocation17], 4294967264  ;;  %v4677_v0 = vld [vmem:[#allocation2 + $0x4] ss:$16 sps:$4 sm:$0xff]   ;;  %v4679_v1 = vld [vmem:[#allocation2 + $0xc] ss:$16 sps:$4 sm:$0xff]  }
  0xb6   :  { %1575 = vmatprep.subr.bf16.mxu0 %v4677_v0  ;;  %v4681_v2 = vld [vmem:[#allocation2] ss:$16 sps:$4 sm:$0xff]   ;;  %v4682_v3 = vld [vmem:[#allocation2 + $0x8] ss:$16 sps:$4 sm:$0xff]   ;;  %1739 = vmatprep.subr.bf16.mxu1 %v4679_v1  ;;  %v4683_v4 = vld [vmem:[#allocation2 + $0x24] ss:$16 sps:$4 sm:$0xff]  }
  0xb7   :  { %1576 = vmatpush1.bf16.msra.mxu0 %v4681_v2  ;;  %1740 = vmatpush1.bf16.msra.mxu1 %v4682_v3  ;;  %v4685_v5 = vld [vmem:[#allocation2 + $0x2c] ss:$16 sps:$4 sm:$0xff]   ;;  %v4687_v6 = vld [vmem:[#allocation2 + $0x20] ss:$16 sps:$4 sm:$0xff]   ;;  %v4688_v7 = vld [vmem:[#allocation2 + $0x28] ss:$16 sps:$4 sm:$0xff]  }
  0xb8   :  { %1577 = vmatprep.subr.bf16.mxu0 %v4683_v4  ;;  %1741 = vmatprep.subr.bf16.mxu1 %v4685_v5  ;;  %v4689_v8 = vld [vmem:[#allocation2 + $0x44] ss:$16 sps:$4 sm:$0xff]   ;;  %v4691_v9 = vld [vmem:[#allocation2 + $0x4c] ss:$16 sps:$4 sm:$0xff]   ;;  %v4693_v10 = vld [vmem:[#allocation2 + $0x40] ss:$16 sps:$4 sm:$0xff]  }
  0xb9   :  { %v4694_v11 = vld [vmem:[#allocation2 + $0x48] ss:$16 sps:$4 sm:$0xff]   ;;  %v4695_v12 = vld [vmem:[#allocation2 + $0x64] ss:$16 sps:$4 sm:$0xff]   ;;  %v4697_v13 = vld [vmem:[#allocation2 + $0x6c] ss:$16 sps:$4 sm:$0xff]  }
  0xba   :  { %v4699_v14 = vld [vmem:[#allocation2 + $0x60] ss:$16 sps:$4 sm:$0xff]   ;;  %v4700_v15 = vld [vmem:[#allocation2 + $0x68] ss:$16 sps:$4 sm:$0xff]   ;;  %v4701_v16 = vld [vmem:[#allocation2 + $0x84] ss:$16 sps:$4 sm:$0xff]  }
  0xbb   :  { %1578 = vmatpush1.bf16.msra.mxu0 %v4687_v6  ;;  %1742 = vmatpush1.bf16.msra.mxu1 %v4688_v7  ;;  %v4703_v17 = vld [vmem:[#allocation2 + $0x8c] ss:$16 sps:$4 sm:$0xff]   ;;  %v4705_v18 = vld [vmem:[#allocation2 + $0x80] ss:$16 sps:$4 sm:$0xff]   ;;  %v4706_v19 = vld [vmem:[#allocation2 + $0x88] ss:$16 sps:$4 sm:$0xff]  }
  0xbc   :  { %1579 = vmatprep.subr.bf16.mxu0 %v4689_v8  ;;  %1743 = vmatprep.subr.bf16.mxu1 %v4691_v9  ;;  %v4707_v20 = vld [vmem:[#allocation2 + $0xa4] ss:$16 sps:$4 sm:$0xff]   ;;  %v4709_v21 = vld [vmem:[#allocation2 + $0xac] ss:$16 sps:$4 sm:$0xff]   ;;  %v4711_v22 = vld [vmem:[#allocation2 + $0xa0] ss:$16 sps:$4 sm:$0xff]  }
  0xbd   :  { %v4712_v23 = vld [vmem:[#allocation2 + $0xa8] ss:$16 sps:$4 sm:$0xff]   ;;  %v4713_v24 = vld [vmem:[#allocation2 + $0xc4] ss:$16 sps:$4 sm:$0xff]   ;;  %v4715_v25 = vld [vmem:[#allocation2 + $0xcc] ss:$16 sps:$4 sm:$0xff]  }
  0xbe   :  { %v4717_v26 = vld [vmem:[#allocation2 + $0xc0] ss:$16 sps:$4 sm:$0xff]   ;;  %v4718_v27 = vld [vmem:[#allocation2 + $0xc8] ss:$16 sps:$4 sm:$0xff]   ;;  %v4719_v28 = vld [vmem:[#allocation2 + $0xe4] ss:$16 sps:$4 sm:$0xff]  }
  0xbf   :  { %1580 = vmatpush1.bf16.msra.mxu0 %v4693_v10  ;;  %1744 = vmatpush1.bf16.msra.mxu1 %v4694_v11  ;;  %v4721_v29 = vld [vmem:[#allocation2 + $0xec] ss:$16 sps:$4 sm:$0xff]   ;;  %v4723_v30 = vld [vmem:[#allocation2 + $0xe0] ss:$16 sps:$4 sm:$0xff]   ;;  %v4724_v31 = vld [vmem:[#allocation2 + $0xe8] ss:$16 sps:$4 sm:$0xff]  }
  0xc0   :  { %1581 = vmatprep.subr.bf16.mxu0 %v4695_v12  ;;  %1745 = vmatprep.subr.bf16.mxu1 %v4697_v13  ;;  %v4725_v32 = vld [vmem:[#allocation2 + $0x104] ss:$16 sps:$4 sm:$0xff]   ;;  %v4727_v33 = vld [vmem:[#allocation2 + $0x10c] ss:$16 sps:$4 sm:$0xff]   ;;  %v4729_v34 = vld [vmem:[#allocation2 + $0x100] ss:$16 sps:$4 sm:$0xff]  }
  0xc1   :  { %v4730_v35 = vld [vmem:[#allocation2 + $0x108] ss:$16 sps:$4 sm:$0xff]   ;;  %v4731_v36 = vld [vmem:[#allocation2 + $0x124] ss:$16 sps:$4 sm:$0xff]   ;;  %v4733_v37 = vld [vmem:[#allocation2 + $0x12c] ss:$16 sps:$4 sm:$0xff]  }
  0xc2   :  { %v4735_v38 = vld [vmem:[#allocation2 + $0x120] ss:$16 sps:$4 sm:$0xff]   ;;  %v4736_v39 = vld [vmem:[#allocation2 + $0x128] ss:$16 sps:$4 sm:$0xff]   ;;  %v4737_v40 = vld [vmem:[#allocation2 + $0x144] ss:$16 sps:$4 sm:$0xff]  }
  0xc3   :  { %1582 = vmatpush1.bf16.msra.mxu0 %v4699_v14  ;;  %1746 = vmatpush1.bf16.msra.mxu1 %v4700_v15  ;;  %v4739_v41 = vld [vmem:[#allocation2 + $0x14c] ss:$16 sps:$4 sm:$0xff]   ;;  %v4741_v42 = vld [vmem:[#allocation2 + $0x140] ss:$16 sps:$4 sm:$0xff]   ;;  %v4742_v43 = vld [vmem:[#allocation2 + $0x148] ss:$16 sps:$4 sm:$0xff]  }
  0xc4   :  { %1583 = vmatprep.subr.bf16.mxu0 %v4701_v16  ;;  %1747 = vmatprep.subr.bf16.mxu1 %v4703_v17  ;;  %v4743_v44 = vld [vmem:[#allocation2 + $0x164] ss:$16 sps:$4 sm:$0xff]   ;;  %v4745_v45 = vld [vmem:[#allocation2 + $0x16c] ss:$16 sps:$4 sm:$0xff]   ;;  %s6057_s19 = sld [smem:[#allocation24_spill]]  ;;  %vm5658_vm0 = vmmov 0  }
  0xc5   :  { %v4747_v47 = vld [vmem:[#allocation2 + $0x160] ss:$16 sps:$4 sm:$0xff]   ;;  %v4748_v49 = vld [vmem:[#allocation2 + $0x168] ss:$16 sps:$4 sm:$0xff]   ;;  %v4749_v50 = vld [vmem:[#allocation2 + $0x184] ss:$16 sps:$4 sm:$0xff]  }
  0xc6   :  { %v4751_v51 = vld [vmem:[#allocation2 + $0x18c] ss:$16 sps:$4 sm:$0xff]   ;;  %v4753_v52 = vld [vmem:[#allocation2 + $0x180] ss:$16 sps:$4 sm:$0xff]   ;;  %v4754_v53 = vld [vmem:[#allocation2 + $0x188] ss:$16 sps:$4 sm:$0xff]  }
  0xc7   :  { %1584 = vmatpush1.bf16.msra.mxu0 %v4705_v18  ;;  %1748 = vmatpush1.bf16.msra.mxu1 %v4706_v19  ;;  %v4755_v54 = vld [vmem:[#allocation2 + $0x1a4] ss:$16 sps:$4 sm:$0xff]   ;;  %v4757_v55 = vld [vmem:[#allocation2 + $0x1ac] ss:$16 sps:$4 sm:$0xff]   ;;  %v4759_v56 = vld [vmem:[#allocation2 + $0x1a0] ss:$16 sps:$4 sm:$0xff]  }
  0xc8   :  { %1585 = vmatprep.subr.bf16.mxu0 %v4707_v20  ;;  %1749 = vmatprep.subr.bf16.mxu1 %v4709_v21  ;;  %v4760_v57 = vld [vmem:[#allocation2 + $0x1a8] ss:$16 sps:$4 sm:$0xff]   ;;  %v4761_v58 = vld [vmem:[#allocation2 + $0x1c4] ss:$16 sps:$4 sm:$0xff]   ;;  %v4763_v59 = vld [vmem:[#allocation2 + $0x1cc] ss:$16 sps:$4 sm:$0xff]  }
  0xc9   :  { %v4765_v60 = vld [vmem:[#allocation2 + $0x1c0] ss:$16 sps:$4 sm:$0xff]   ;;  %v4766_v61 = vld [vmem:[#allocation2 + $0x1c8] ss:$16 sps:$4 sm:$0xff]   ;;  %v4767_v62 = vld [vmem:[#allocation2 + $0x1e4] ss:$16 sps:$4 sm:$0xff]  }
  0xca   :  { %v180_v46 = vld [vmem:[%s6057_s19] sm:$0xff]  ;;  %v4769_v63 = vld [vmem:[#allocation2 + $0x1ec] ss:$16 sps:$4 sm:$0xff]   ;;  %v4772_v1 = vld [vmem:[#allocation2 + $0x1e8] ss:$16 sps:$4 sm:$0xff]  }
  0xcb   :  { %1586 = vmatpush1.bf16.msra.mxu0 %v4711_v22  ;;  %1750 = vmatpush1.bf16.msra.mxu1 %v4712_v23  ;;  %v4066_v48 = vcombine.high %v180_v46, %v180_v46  ;;  %v4771_v0 = vld [vmem:[#allocation2 + $0x1e0] ss:$16 sps:$4 sm:$0xff]   ;;  %v4777_v2 = vld [vmem:[#allocation2 + $0x204] ss:$16 sps:$4 sm:$0xff]   ;;  %v4780_v3 = vld [vmem:[#allocation2 + $0x20c] ss:$16 sps:$4 sm:$0xff]   ;;  %v4065_v4 = vcombine.low %v180_v46, %v180_v46 }
  0xcc   :  { %1587 = vmatprep.subr.bf16.mxu0 %v4713_v24  ;;  %1751 = vmatprep.subr.bf16.mxu1 %v4715_v25  ;;  %v4775_v5 = vld [vmem:[#allocation2 + $0x200] ss:$16 sps:$4 sm:$0xff]   ;;  %v4778_v6 = vld [vmem:[#allocation2 + $0x208] ss:$16 sps:$4 sm:$0xff]   ;;  %v4783_v7 = vld [vmem:[#allocation2 + $0x224] ss:$16 sps:$4 sm:$0xff]  }
  0xcd   :  { %1607 = vmatprep.mubr.bf16.mxu0 %v4066_v48  ;;  %1771 = vmatprep.mubr.bf16.mxu1 %v4066_v48  ;;  %v4786_v8 = vld [vmem:[#allocation2 + $0x22c] ss:$16 sps:$4 sm:$0xff]   ;;  %v4781_v9 = vld [vmem:[#allocation2 + $0x220] ss:$16 sps:$4 sm:$0xff]   ;;  %v4784_v10 = vld [vmem:[#allocation2 + $0x228] ss:$16 sps:$4 sm:$0xff]  }
  0xce   :  { %v4789_v11 = vld [vmem:[#allocation2 + $0x244] ss:$16 sps:$4 sm:$0xff]   ;;  %v4792_v12 = vld [vmem:[#allocation2 + $0x24c] ss:$16 sps:$4 sm:$0xff]   ;;  %v4787_v13 = vld [vmem:[#allocation2 + $0x240] ss:$16 sps:$4 sm:$0xff]  }
  0xcf   :  { %1588 = vmatpush1.bf16.msra.mxu0 %v4717_v26  ;;  %1752 = vmatpush1.bf16.msra.mxu1 %v4718_v27  ;;  %v4790_v14 = vld [vmem:[#allocation2 + $0x248] ss:$16 sps:$4 sm:$0xff]   ;;  %v4795_v15 = vld [vmem:[#allocation2 + $0x264] ss:$16 sps:$4 sm:$0xff]   ;;  %v4798_v16 = vld [vmem:[#allocation2 + $0x26c] ss:$16 sps:$4 sm:$0xff]  }
  0xd0   :  { %1589 = vmatprep.subr.bf16.mxu0 %v4719_v28  ;;  %1753 = vmatprep.subr.bf16.mxu1 %v4721_v29  ;;  %v4793_v17 = vld [vmem:[#allocation2 + $0x260] ss:$16 sps:$4 sm:$0xff]   ;;  %v4796_v18 = vld [vmem:[#allocation2 + $0x268] ss:$16 sps:$4 sm:$0xff]   ;;  %v4801_v19 = vld [vmem:[#allocation2 + $0x284] ss:$16 sps:$4 sm:$0xff]  }
  0xd1   :  { %v4804_v20 = vld [vmem:[#allocation2 + $0x28c] ss:$16 sps:$4 sm:$0xff]   ;;  %v4799_v21 = vld [vmem:[#allocation2 + $0x280] ss:$16 sps:$4 sm:$0xff]   ;;  %v4802_v22 = vld [vmem:[#allocation2 + $0x288] ss:$16 sps:$4 sm:$0xff]  }
  0xd2   :  { %v4807_v23 = vld [vmem:[#allocation2 + $0x2a4] ss:$16 sps:$4 sm:$0xff]   ;;  %v4810_v24 = vld [vmem:[#allocation2 + $0x2ac] ss:$16 sps:$4 sm:$0xff]   ;;  %v4805_v25 = vld [vmem:[#allocation2 + $0x2a0] ss:$16 sps:$4 sm:$0xff]  }
  0xd3   :  { %1590 = vmatpush1.bf16.msra.mxu0 %v4723_v30  ;;  %1754 = vmatpush1.bf16.msra.mxu1 %v4724_v31  ;;  %v4808_v26 = vld [vmem:[#allocation2 + $0x2a8] ss:$16 sps:$4 sm:$0xff]   ;;  %v4813_v27 = vld [vmem:[#allocation2 + $0x2c4] ss:$16 sps:$4 sm:$0xff]   ;;  %v4816_v28 = vld [vmem:[#allocation2 + $0x2cc] ss:$16 sps:$4 sm:$0xff]  }
  0xd4   :  { %1591 = vmatprep.subr.bf16.mxu0 %v4725_v32  ;;  %1755 = vmatprep.subr.bf16.mxu1 %v4727_v33  ;;  %v5887_v29 = vld [vmem:[%s6057_s19 + $0x8] sm:$0xff]  ;;  %v4811_v31 = vld [vmem:[#allocation2 + $0x2c0] ss:$16 sps:$4 sm:$0xff]   ;;  %v4819_v33 = vld [vmem:[#allocation2 + $0x2e4] ss:$16 sps:$4 sm:$0xff]  }
  0xd5   :  { %v4068_v30 = vcombine.high %v5887_v29, %v5887_v29  ;;  %v4814_v32 = vld [vmem:[#allocation2 + $0x2c8] ss:$16 sps:$4 sm:$0xff]   ;;  %v4840_v46 = vld [vmem:[#allocation2 + $0x34c] ss:$16 sps:$4 sm:$0xff]  }
  0xd6   :  { %v4838_v48 = vld [vmem:[#allocation2 + $0x348] ss:$16 sps:$4 sm:$0xff]  }
  0xd7   :  { %1592 = vmatpush1.bf16.msra.mxu0 %v4729_v34  ;;  %1756 = vmatpush1.bf16.msra.mxu1 %v4730_v35  ;;  %v4822_v34 = vld [vmem:[#allocation2 + $0x2ec] ss:$16 sps:$4 sm:$0xff]   ;;  %v4817_v35 = vld [vmem:[#allocation2 + $0x2e0] ss:$16 sps:$4 sm:$0xff]  }
  0xd8   :  { %1593 = vmatprep.subr.bf16.mxu0 %v4731_v36  ;;  %1757 = vmatprep.subr.bf16.mxu1 %v4733_v37  ;;  %v4820_v36 = vld [vmem:[#allocation2 + $0x2e8] ss:$16 sps:$4 sm:$0xff]   ;;  %v4825_v37 = vld [vmem:[#allocation2 + $0x304] ss:$16 sps:$4 sm:$0xff]  }
  0xdb   :  { %1594 = vmatpush1.bf16.msra.mxu0 %v4735_v38  ;;  %1758 = vmatpush1.bf16.msra.mxu1 %v4736_v39  ;;  %v4828_v38 = vld [vmem:[#allocation2 + $0x30c] ss:$16 sps:$4 sm:$0xff]   ;;  %v4823_v39 = vld [vmem:[#allocation2 + $0x300] ss:$16 sps:$4 sm:$0xff]  }
  0xdc   :  { %1595 = vmatprep.subr.bf16.mxu0 %v4737_v40  ;;  %1759 = vmatprep.subr.bf16.mxu1 %v4739_v41  ;;  %v4826_v40 = vld [vmem:[#allocation2 + $0x308] ss:$16 sps:$4 sm:$0xff]   ;;  %v4831_v41 = vld [vmem:[#allocation2 + $0x324] ss:$16 sps:$4 sm:$0xff]  }
  0xdf   :  { %1596 = vmatpush1.bf16.msra.mxu0 %v4741_v42  ;;  %1760 = vmatpush1.bf16.msra.mxu1 %v4742_v43  ;;  %v4834_v42 = vld [vmem:[#allocation2 + $0x32c] ss:$16 sps:$4 sm:$0xff]   ;;  %v4829_v43 = vld [vmem:[#allocation2 + $0x320] ss:$16 sps:$4 sm:$0xff]  }
  0xe0   :  { %1597 = vmatprep.subr.bf16.mxu0 %v4743_v44  ;;  %1761 = vmatprep.subr.bf16.mxu1 %v4745_v45  ;;  %v4832_v44 = vld [vmem:[#allocation2 + $0x328] ss:$16 sps:$4 sm:$0xff]   ;;  %v4837_v45 = vld [vmem:[#allocation2 + $0x344] ss:$16 sps:$4 sm:$0xff]  }
  0xe3   :  { %1598 = vmatpush1.bf16.msra.mxu0 %v4747_v47  ;;  %1762 = vmatpush1.bf16.msra.mxu1 %v4748_v49  ;;  %v4835_v47 = vld [vmem:[#allocation2 + $0x340] ss:$16 sps:$4 sm:$0xff]   ;;  %v4843_v49 = vld [vmem:[#allocation2 + $0x364] ss:$16 sps:$4 sm:$0xff]  }
  0xe4   :  { %1599 = vmatprep.subr.bf16.mxu0 %v4749_v50  ;;  %1763 = vmatprep.subr.bf16.mxu1 %v4751_v51  ;;  %v4846_v50 = vld [vmem:[#allocation2 + $0x36c] ss:$16 sps:$4 sm:$0xff]   ;;  %v4841_v51 = vld [vmem:[#allocation2 + $0x360] ss:$16 sps:$4 sm:$0xff]  }
  0xe7   :  { %1600 = vmatpush1.bf16.msra.mxu0 %v4753_v52  ;;  %1764 = vmatpush1.bf16.msra.mxu1 %v4754_v53  ;;  %v4844_v52 = vld [vmem:[#allocation2 + $0x368] ss:$16 sps:$4 sm:$0xff]   ;;  %v4849_v53 = vld [vmem:[#allocation2 + $0x384] ss:$16 sps:$4 sm:$0xff]  }
  0xe8   :  { %1601 = vmatprep.subr.bf16.mxu0 %v4755_v54  ;;  %1765 = vmatprep.subr.bf16.mxu1 %v4757_v55  ;;  %v4852_v54 = vld [vmem:[#allocation2 + $0x38c] ss:$16 sps:$4 sm:$0xff]   ;;  %v4847_v55 = vld [vmem:[#allocation2 + $0x380] ss:$16 sps:$4 sm:$0xff]  }
  0xeb   :  { %1602 = vmatpush1.bf16.msra.mxu0 %v4759_v56  ;;  %1766 = vmatpush1.bf16.msra.mxu1 %v4760_v57  ;;  %v4850_v56 = vld [vmem:[#allocation2 + $0x388] ss:$16 sps:$4 sm:$0xff]   ;;  %v4855_v57 = vld [vmem:[#allocation2 + $0x3a4] ss:$16 sps:$4 sm:$0xff]  }
  0xec   :  { %1603 = vmatprep.subr.bf16.mxu0 %v4761_v58  ;;  %1767 = vmatprep.subr.bf16.mxu1 %v4763_v59  ;;  %v4858_v58 = vld [vmem:[#allocation2 + $0x3ac] ss:$16 sps:$4 sm:$0xff]   ;;  %v4853_v59 = vld [vmem:[#allocation2 + $0x3a0] ss:$16 sps:$4 sm:$0xff]  }
  0xef   :  { %1604 = vmatpush1.bf16.msra.mxu0 %v4765_v60  ;;  %1768 = vmatpush1.bf16.msra.mxu1 %v4766_v61  ;;  %v4856_v60 = vld [vmem:[#allocation2 + $0x3a8] ss:$16 sps:$4 sm:$0xff]   ;;  %v4861_v61 = vld [vmem:[#allocation2 + $0x3c4] ss:$16 sps:$4 sm:$0xff]  }
  0xf0   :  { %1605 = vmatprep.subr.bf16.mxu0 %v4767_v62  ;;  %1769 = vmatprep.subr.bf16.mxu1 %v4769_v63  ;;  %v4864_v62 = vld [vmem:[#allocation2 + $0x3cc] ss:$16 sps:$4 sm:$0xff]   ;;  %v4859_v63 = vld [vmem:[#allocation2 + $0x3c0] ss:$16 sps:$4 sm:$0xff]  }
  0xf3   :  { %1606 = vmatpush1.bf16.msra.mxu0 %v4771_v0  ;;  %1770 = vmatpush1.bf16.msra.mxu1 %v4772_v1  ;;  %v4862_v0 = vld [vmem:[#allocation2 + $0x3c8] ss:$16 sps:$4 sm:$0xff]   ;;  %v4867_v1 = vld [vmem:[#allocation2 + $0x3e4] ss:$16 sps:$4 sm:$0xff]  }
  0xf4   :  { %1616 = vmatprep.subr.bf16.mxu0 %v4777_v2  ;;  %1780 = vmatprep.subr.bf16.mxu1 %v4780_v3  ;;  %v4870_v2 = vld [vmem:[#allocation2 + $0x3ec] ss:$16 sps:$4 sm:$0xff]   ;;  %v4865_v3 = vld [vmem:[#allocation2 + $0x3e0] ss:$16 sps:$4 sm:$0xff]  }
  0xf6   :  { %1608 = vmatmul.mubr.bf16.vlgmr.msra.gmra.mrb[0].mxu0 %v4065_v4  ;;  %1772 = vmatmul.mubr.bf16.vlgmr.msra.gmra.mrb[0].mxu1 %v4065_v4  ;;  %v4868_v4 = vld [vmem:[#allocation2 + $0x3e8] ss:$16 sps:$4 sm:$0xff]  }
  0xf7   :  { %1617 = vmatpush1.bf16.msra.mxu0 %v4775_v5  ;;  %1781 = vmatpush1.bf16.msra.mxu1 %v4778_v6  ;;  %v4875_v5 = vld [vmem:[#allocation2 + $0x404] ss:$16 sps:$4 sm:$0xff]   ;;  %v4878_v6 = vld [vmem:[#allocation2 + $0x40c] ss:$16 sps:$4 sm:$0xff]  }
  0xf8   :  { %1618 = vmatprep.subr.bf16.mxu0 %v4783_v7  ;;  %1782 = vmatprep.subr.bf16.mxu1 %v4786_v8  ;;  %v4067_v7 = vcombine.low %v5887_v29, %v5887_v29  ;;  %v4873_v8 = vld [vmem:[#allocation2 + $0x400] ss:$16 sps:$4 sm:$0xff]   ;;  %v4908_v29 = vld [vmem:[#allocation2 + $0x4ac] ss:$16 sps:$4 sm:$0xff]  }
  0xf9   :  { %1648 = vmatprep.mubr.bf16.mxu0 %v4068_v30  ;;  %1812 = vmatprep.mubr.bf16.mxu1 %v4068_v30  ;;  %v4903_v30 = vld [vmem:[#allocation2 + $0x4a0] ss:$16 sps:$4 sm:$0xff]  }
  0xfb   :  { %1619 = vmatpush1.bf16.msra.mxu0 %v4781_v9  ;;  %1783 = vmatpush1.bf16.msra.mxu1 %v4784_v10  ;;  %v4876_v9 = vld [vmem:[#allocation2 + $0x408] ss:$16 sps:$4 sm:$0xff]   ;;  %v4881_v10 = vld [vmem:[#allocation2 + $0x424] ss:$16 sps:$4 sm:$0xff]  }
  0xfc   :  { %1620 = vmatprep.subr.bf16.mxu0 %v4789_v11  ;;  %1784 = vmatprep.subr.bf16.mxu1 %v4792_v12  ;;  %v5896_v11 = vld [vmem:[%s6057_s19 + $0x10] sm:$0xff]  ;;  %v4884_v12 = vld [vmem:[#allocation2 + $0x42c] ss:$16 sps:$4 sm:$0xff]  }
  0xff   :  { %1621 = vmatpush1.bf16.msra.mxu0 %v4787_v13  ;;  %1785 = vmatpush1.bf16.msra.mxu1 %v4790_v14  ;;  %v4070_v13 = vcombine.high %v5896_v11, %v5896_v11  ;;  %v4879_v14 = vld [vmem:[#allocation2 + $0x420] ss:$16 sps:$4 sm:$0xff]  }
 0x100   :  { %1622 = vmatprep.subr.bf16.mxu0 %v4795_v15  ;;  %1786 = vmatprep.subr.bf16.mxu1 %v4798_v16  ;;  %v4882_v15 = vld [vmem:[#allocation2 + $0x428] ss:$16 sps:$4 sm:$0xff]   ;;  %v4887_v16 = vld [vmem:[#allocation2 + $0x444] ss:$16 sps:$4 sm:$0xff]  }
 0x103   :  { %1623 = vmatpush1.bf16.msra.mxu0 %v4793_v17  ;;  %1787 = vmatpush1.bf16.msra.mxu1 %v4796_v18  ;;  %v4890_v17 = vld [vmem:[#allocation2 + $0x44c] ss:$16 sps:$4 sm:$0xff]   ;;  %v4885_v18 = vld [vmem:[#allocation2 + $0x440] ss:$16 sps:$4 sm:$0xff]  }
 0x104   :  { %1624 = vmatprep.subr.bf16.mxu0 %v4801_v19  ;;  %1788 = vmatprep.subr.bf16.mxu1 %v4804_v20  ;;  %v4888_v19 = vld [vmem:[#allocation2 + $0x448] ss:$16 sps:$4 sm:$0xff]   ;;  %v4893_v20 = vld [vmem:[#allocation2 + $0x464] ss:$16 sps:$4 sm:$0xff]  }
 0x107   :  { %1625 = vmatpush1.bf16.msra.mxu0 %v4799_v21  ;;  %1789 = vmatpush1.bf16.msra.mxu1 %v4802_v22  ;;  %v4896_v21 = vld [vmem:[#allocation2 + $0x46c] ss:$16 sps:$4 sm:$0xff]   ;;  %v4891_v22 = vld [vmem:[#allocation2 + $0x460] ss:$16 sps:$4 sm:$0xff]  }
 0x108   :  { %1626 = vmatprep.subr.bf16.mxu0 %v4807_v23  ;;  %1790 = vmatprep.subr.bf16.mxu1 %v4810_v24  ;;  %v4894_v23 = vld [vmem:[#allocation2 + $0x468] ss:$16 sps:$4 sm:$0xff]   ;;  %v4899_v24 = vld [vmem:[#allocation2 + $0x484] ss:$16 sps:$4 sm:$0xff]  }
 0x10b   :  { %1627 = vmatpush1.bf16.msra.mxu0 %v4805_v25  ;;  %1791 = vmatpush1.bf16.msra.mxu1 %v4808_v26  ;;  %v4902_v25 = vld [vmem:[#allocation2 + $0x48c] ss:$16 sps:$4 sm:$0xff]   ;;  %v4897_v26 = vld [vmem:[#allocation2 + $0x480] ss:$16 sps:$4 sm:$0xff]  }
 0x10c   :  { %1628 = vmatprep.subr.bf16.mxu0 %v4813_v27  ;;  %1792 = vmatprep.subr.bf16.mxu1 %v4816_v28  ;;  %v4900_v27 = vld [vmem:[#allocation2 + $0x488] ss:$16 sps:$4 sm:$0xff]   ;;  %v4905_v28 = vld [vmem:[#allocation2 + $0x4a4] ss:$16 sps:$4 sm:$0xff]  }
 0x10f   :  { %1629 = vmatpush1.bf16.msra.mxu0 %v4811_v31  ;;  %1793 = vmatpush1.bf16.msra.mxu1 %v4814_v32  ;;  %v4906_v31 = vld [vmem:[#allocation2 + $0x4a8] ss:$16 sps:$4 sm:$0xff]   ;;  %v4911_v32 = vld [vmem:[#allocation2 + $0x4c4] ss:$16 sps:$4 sm:$0xff]  }
 0x110   :  { %1630 = vmatprep.subr.bf16.mxu0 %v4819_v33  ;;  %1794 = vmatprep.subr.bf16.mxu1 %v4822_v34  ;;  %v4914_v33 = vld [vmem:[#allocation2 + $0x4cc] ss:$16 sps:$4 sm:$0xff]   ;;  %v4909_v34 = vld [vmem:[#allocation2 + $0x4c0] ss:$16 sps:$4 sm:$0xff]  }
 0x113   :  { %1631 = vmatpush1.bf16.msra.mxu0 %v4817_v35  ;;  %1795 = vmatpush1.bf16.msra.mxu1 %v4820_v36  ;;  %v4912_v35 = vld [vmem:[#allocation2 + $0x4c8] ss:$16 sps:$4 sm:$0xff]   ;;  %v4917_v36 = vld [vmem:[#allocation2 + $0x4e4] ss:$16 sps:$4 sm:$0xff]  }
 0x114   :  { %1632 = vmatprep.subr.bf16.mxu0 %v4825_v37  ;;  %1796 = vmatprep.subr.bf16.mxu1 %v4828_v38  ;;  %v4920_v37 = vld [vmem:[#allocation2 + $0x4ec] ss:$16 sps:$4 sm:$0xff]   ;;  %v4915_v38 = vld [vmem:[#allocation2 + $0x4e0] ss:$16 sps:$4 sm:$0xff]  }
 0x117   :  { %1633 = vmatpush1.bf16.msra.mxu0 %v4823_v39  ;;  %1797 = vmatpush1.bf16.msra.mxu1 %v4826_v40  ;;  %v4918_v39 = vld [vmem:[#allocation2 + $0x4e8] ss:$16 sps:$4 sm:$0xff]   ;;  %v4923_v40 = vld [vmem:[#allocation2 + $0x504] ss:$16 sps:$4 sm:$0xff]  }
 0x118   :  { %1634 = vmatprep.subr.bf16.mxu0 %v4831_v41  ;;  %1798 = vmatprep.subr.bf16.mxu1 %v4834_v42  ;;  %v4926_v41 = vld [vmem:[#allocation2 + $0x50c] ss:$16 sps:$4 sm:$0xff]   ;;  %v4921_v42 = vld [vmem:[#allocation2 + $0x500] ss:$16 sps:$4 sm:$0xff]  }
 0x11b   :  { %1635 = vmatpush1.bf16.msra.mxu0 %v4829_v43  ;;  %1799 = vmatpush1.bf16.msra.mxu1 %v4832_v44  ;;  %v4924_v43 = vld [vmem:[#allocation2 + $0x508] ss:$16 sps:$4 sm:$0xff]   ;;  %v4929_v44 = vld [vmem:[#allocation2 + $0x524] ss:$16 sps:$4 sm:$0xff]  }
 0x11c   :  { %1636 = vmatprep.subr.bf16.mxu0 %v4837_v45  ;;  %1800 = vmatprep.subr.bf16.mxu1 %v4840_v46  ;;  %v4932_v45 = vld [vmem:[#allocation2 + $0x52c] ss:$16 sps:$4 sm:$0xff]   ;;  %v4927_v46 = vld [vmem:[#allocation2 + $0x520] ss:$16 sps:$4 sm:$0xff]  }
 0x11f   :  { %1637 = vmatpush1.bf16.msra.mxu0 %v4835_v47  ;;  %1801 = vmatpush1.bf16.msra.mxu1 %v4838_v48  ;;  %v4930_v47 = vld [vmem:[#allocation2 + $0x528] ss:$16 sps:$4 sm:$0xff]   ;;  %v4935_v48 = vld [vmem:[#allocation2 + $0x544] ss:$16 sps:$4 sm:$0xff]  }
 0x120   :  { %1638 = vmatprep.subr.bf16.mxu0 %v4843_v49  ;;  %1802 = vmatprep.subr.bf16.mxu1 %v4846_v50  ;;  %v4938_v49 = vld [vmem:[#allocation2 + $0x54c] ss:$16 sps:$4 sm:$0xff]   ;;  %v4933_v50 = vld [vmem:[#allocation2 + $0x540] ss:$16 sps:$4 sm:$0xff]  }
 0x123   :  { %1639 = vmatpush1.bf16.msra.mxu0 %v4841_v51  ;;  %1803 = vmatpush1.bf16.msra.mxu1 %v4844_v52  ;;  %v4936_v51 = vld [vmem:[#allocation2 + $0x548] ss:$16 sps:$4 sm:$0xff]   ;;  %v4941_v52 = vld [vmem:[#allocation2 + $0x564] ss:$16 sps:$4 sm:$0xff]  }
 0x124   :  { %1640 = vmatprep.subr.bf16.mxu0 %v4849_v53  ;;  %1804 = vmatprep.subr.bf16.mxu1 %v4852_v54  ;;  %v4944_v53 = vld [vmem:[#allocation2 + $0x56c] ss:$16 sps:$4 sm:$0xff]   ;;  %v4939_v54 = vld [vmem:[#allocation2 + $0x560] ss:$16 sps:$4 sm:$0xff]  }
 0x127   :  { %1641 = vmatpush1.bf16.msra.mxu0 %v4847_v55  ;;  %1805 = vmatpush1.bf16.msra.mxu1 %v4850_v56  ;;  %v4942_v55 = vld [vmem:[#allocation2 + $0x568] ss:$16 sps:$4 sm:$0xff]   ;;  %v4947_v56 = vld [vmem:[#allocation2 + $0x584] ss:$16 sps:$4 sm:$0xff]  }
 0x128   :  { %1642 = vmatprep.subr.bf16.mxu0 %v4855_v57  ;;  %1806 = vmatprep.subr.bf16.mxu1 %v4858_v58  ;;  %v4950_v57 = vld [vmem:[#allocation2 + $0x58c] ss:$16 sps:$4 sm:$0xff]   ;;  %v4945_v58 = vld [vmem:[#allocation2 + $0x580] ss:$16 sps:$4 sm:$0xff]  }
 0x12b   :  { %1643 = vmatpush1.bf16.msra.mxu0 %v4853_v59  ;;  %1807 = vmatpush1.bf16.msra.mxu1 %v4856_v60  ;;  %v4948_v59 = vld [vmem:[#allocation2 + $0x588] ss:$16 sps:$4 sm:$0xff]   ;;  %v4953_v60 = vld [vmem:[#allocation2 + $0x5a4] ss:$16 sps:$4 sm:$0xff]  }
 0x12c   :  { %1644 = vmatprep.subr.bf16.mxu0 %v4861_v61  ;;  %1808 = vmatprep.subr.bf16.mxu1 %v4864_v62  ;;  %v4956_v61 = vld [vmem:[#allocation2 + $0x5ac] ss:$16 sps:$4 sm:$0xff]   ;;  %v4951_v62 = vld [vmem:[#allocation2 + $0x5a0] ss:$16 sps:$4 sm:$0xff]  }
 0x12f   :  { %1645 = vmatpush1.bf16.msra.mxu0 %v4859_v63  ;;  %1809 = vmatpush1.bf16.msra.mxu1 %v4862_v0  ;;  %v4954_v63 = vld [vmem:[#allocation2 + $0x5a8] ss:$16 sps:$4 sm:$0xff]   ;;  %v4959_v0 = vld [vmem:[#allocation2 + $0x5c4] ss:$16 sps:$4 sm:$0xff]  }
 0x130   :  { %1646 = vmatprep.subr.bf16.mxu0 %v4867_v1  ;;  %1810 = vmatprep.subr.bf16.mxu1 %v4870_v2  ;;  %v4962_v1 = vld [vmem:[#allocation2 + $0x5cc] ss:$16 sps:$4 sm:$0xff]   ;;  %v4957_v2 = vld [vmem:[#allocation2 + $0x5c0] ss:$16 sps:$4 sm:$0xff]  }
 0x133   :  { %1647 = vmatpush1.bf16.msra.mxu0 %v4865_v3  ;;  %1811 = vmatpush1.bf16.msra.mxu1 %v4868_v4  ;;  %v4960_v3 = vld [vmem:[#allocation2 + $0x5c8] ss:$16 sps:$4 sm:$0xff]   ;;  %v4965_v4 = vld [vmem:[#allocation2 + $0x5e4] ss:$16 sps:$4 sm:$0xff]  }
 0x134   :  { %1657 = vmatprep.subr.bf16.mxu0 %v4875_v5  ;;  %1821 = vmatprep.subr.bf16.mxu1 %v4878_v6  ;;  %v4968_v5 = vld [vmem:[#allocation2 + $0x5ec] ss:$16 sps:$4 sm:$0xff]   ;;  %v4963_v6 = vld [vmem:[#allocation2 + $0x5e0] ss:$16 sps:$4 sm:$0xff]  }
 0x136   :  { %1649 = vmatmul.mubr.bf16.vlgmr.msra.gmra.mrb[0].mxu0 %v4067_v7  ;;  %1813 = vmatmul.mubr.bf16.vlgmr.msra.gmra.mrb[0].mxu1 %v4067_v7  ;;  %v4966_v7 = vld [vmem:[#allocation2 + $0x5e8] ss:$16 sps:$4 sm:$0xff]  }
 0x137   :  { %1658 = vmatpush1.bf16.msra.mxu0 %v4873_v8  ;;  %1822 = vmatpush1.bf16.msra.mxu1 %v4876_v9  ;;  %v4973_v8 = vld [vmem:[#allocation2 + $0x604] ss:$16 sps:$4 sm:$0xff]   ;;  %v4976_v9 = vld [vmem:[#allocation2 + $0x60c] ss:$16 sps:$4 sm:$0xff]  }
 0x138   :  { %1659 = vmatprep.subr.bf16.mxu0 %v4881_v10  ;;  %1823 = vmatprep.subr.bf16.mxu1 %v4884_v12  ;;  %v4971_v10 = vld [vmem:[#allocation2 + $0x600] ss:$16 sps:$4 sm:$0xff]   ;;  %v4974_v12 = vld [vmem:[#allocation2 + $0x608] ss:$16 sps:$4 sm:$0xff]  }
 0x139   :  { %1689 = vmatprep.mubr.bf16.mxu0 %v4070_v13  ;;  %1853 = vmatprep.mubr.bf16.mxu1 %v4070_v13  ;;  %v4069_v13 = vcombine.low %v5896_v11, %v5896_v11  ;;  %v4991_v11 = vld [vmem:[#allocation2 + $0x664] ss:$16 sps:$4 sm:$0xff]  }
 0x13b   :  { %1660 = vmatpush1.bf16.msra.mxu0 %v4879_v14  ;;  %1824 = vmatpush1.bf16.msra.mxu1 %v4882_v15  ;;  %v4979_v14 = vld [vmem:[#allocation2 + $0x624] ss:$16 sps:$4 sm:$0xff]   ;;  %v4982_v15 = vld [vmem:[#allocation2 + $0x62c] ss:$16 sps:$4 sm:$0xff]  }
 0x13c   :  { %1661 = vmatprep.subr.bf16.mxu0 %v4887_v16  ;;  %1825 = vmatprep.subr.bf16.mxu1 %v4890_v17  ;;  %v4977_v16 = vld [vmem:[#allocation2 + $0x620] ss:$16 sps:$4 sm:$0xff]   ;;  %v4980_v17 = vld [vmem:[#allocation2 + $0x628] ss:$16 sps:$4 sm:$0xff]  }
 0x13f   :  { %1662 = vmatpush1.bf16.msra.mxu0 %v4885_v18  ;;  %1826 = vmatpush1.bf16.msra.mxu1 %v4888_v19  ;;  %v4985_v18 = vld [vmem:[#allocation2 + $0x644] ss:$16 sps:$4 sm:$0xff]   ;;  %v4988_v19 = vld [vmem:[#allocation2 + $0x64c] ss:$16 sps:$4 sm:$0xff]  }
 0x140   :  { %1663 = vmatprep.subr.bf16.mxu0 %v4893_v20  ;;  %1827 = vmatprep.subr.bf16.mxu1 %v4896_v21  ;;  %v4983_v20 = vld [vmem:[#allocation2 + $0x640] ss:$16 sps:$4 sm:$0xff]   ;;  %v4986_v21 = vld [vmem:[#allocation2 + $0x648] ss:$16 sps:$4 sm:$0xff]  }
 0x143   :  { %1664 = vmatpush1.bf16.msra.mxu0 %v4891_v22  ;;  %1828 = vmatpush1.bf16.msra.mxu1 %v4894_v23  ;;  %v5656_v22 = vmov 0   ;;  %v4994_v23 = vld [vmem:[#allocation2 + $0x66c] ss:$16 sps:$4 sm:$0xff]  }
 0x144   :  { %1665 = vmatprep.subr.bf16.mxu0 %v4899_v24  ;;  %1829 = vmatprep.subr.bf16.mxu1 %v4902_v25  ;;  %v4989_v24 = vld [vmem:[#allocation2 + $0x660] ss:$16 sps:$4 sm:$0xff]   ;;  %v4992_v25 = vld [vmem:[#allocation2 + $0x668] ss:$16 sps:$4 sm:$0xff]  }
 0x147   :  { %1666 = vmatpush1.bf16.msra.mxu0 %v4897_v26  ;;  %1830 = vmatpush1.bf16.msra.mxu1 %v4900_v27  ;;  %v4997_v26 = vld [vmem:[#allocation2 + $0x684] ss:$16 sps:$4 sm:$0xff]   ;;  %v5000_v27 = vld [vmem:[#allocation2 + $0x68c] ss:$16 sps:$4 sm:$0xff]  }
 0x148   :  { %1667 = vmatprep.subr.bf16.mxu0 %v4905_v28  ;;  %1831 = vmatprep.subr.bf16.mxu1 %v4908_v29  ;;  %v4995_v28 = vld [vmem:[#allocation2 + $0x680] ss:$16 sps:$4 sm:$0xff]   ;;  %v4998_v29 = vld [vmem:[#allocation2 + $0x688] ss:$16 sps:$4 sm:$0xff]  }
 0x14b   :  { %1668 = vmatpush1.bf16.msra.mxu0 %v4903_v30  ;;  %1832 = vmatpush1.bf16.msra.mxu1 %v4906_v31  ;;  %v5003_v30 = vld [vmem:[#allocation2 + $0x6a4] ss:$16 sps:$4 sm:$0xff]   ;;  %v5006_v31 = vld [vmem:[#allocation2 + $0x6ac] ss:$16 sps:$4 sm:$0xff]  }
 0x14c   :  { %1669 = vmatprep.subr.bf16.mxu0 %v4911_v32  ;;  %1833 = vmatprep.subr.bf16.mxu1 %v4914_v33  ;;  %v5001_v32 = vld [vmem:[#allocation2 + $0x6a0] ss:$16 sps:$4 sm:$0xff]   ;;  %v5004_v33 = vld [vmem:[#allocation2 + $0x6a8] ss:$16 sps:$4 sm:$0xff]  }
 0x14f   :  { %1670 = vmatpush1.bf16.msra.mxu0 %v4909_v34  ;;  %1834 = vmatpush1.bf16.msra.mxu1 %v4912_v35  ;;  %v5009_v34 = vld [vmem:[#allocation2 + $0x6c4] ss:$16 sps:$4 sm:$0xff]   ;;  %v5012_v35 = vld [vmem:[#allocation2 + $0x6cc] ss:$16 sps:$4 sm:$0xff]  }
 0x150   :  { %1671 = vmatprep.subr.bf16.mxu0 %v4917_v36  ;;  %1835 = vmatprep.subr.bf16.mxu1 %v4920_v37  ;;  %v5007_v36 = vld [vmem:[#allocation2 + $0x6c0] ss:$16 sps:$4 sm:$0xff]   ;;  %v5010_v37 = vld [vmem:[#allocation2 + $0x6c8] ss:$16 sps:$4 sm:$0xff]  }
 0x153   :  { %1672 = vmatpush1.bf16.msra.mxu0 %v4915_v38  ;;  %1836 = vmatpush1.bf16.msra.mxu1 %v4918_v39  ;;  %v5015_v38 = vld [vmem:[#allocation2 + $0x6e4] ss:$16 sps:$4 sm:$0xff]   ;;  %v5018_v39 = vld [vmem:[#allocation2 + $0x6ec] ss:$16 sps:$4 sm:$0xff]  }
 0x154   :  { %1673 = vmatprep.subr.bf16.mxu0 %v4923_v40  ;;  %1837 = vmatprep.subr.bf16.mxu1 %v4926_v41  ;;  %v5013_v40 = vld [vmem:[#allocation2 + $0x6e0] ss:$16 sps:$4 sm:$0xff]   ;;  %v5016_v41 = vld [vmem:[#allocation2 + $0x6e8] ss:$16 sps:$4 sm:$0xff]  }
 0x157   :  { %1674 = vmatpush1.bf16.msra.mxu0 %v4921_v42  ;;  %1838 = vmatpush1.bf16.msra.mxu1 %v4924_v43  ;;  %v5022_v42 = vld [vmem:[#allocation6 + $0x4] ss:$16 sps:$4 sm:$0xff]   ;;  %v5025_v43 = vld [vmem:[#allocation6 + $0xc] ss:$16 sps:$4 sm:$0xff]  }
 0x158   :  { %1675 = vmatprep.subr.bf16.mxu0 %v4929_v44  ;;  %1839 = vmatprep.subr.bf16.mxu1 %v4932_v45  ;;  %v5019_v44 = vld [vmem:[%s6057_s19 + $0x18] ss:$0 sps:$4 sm:$0xff]   ;;  %v5020_v45 = vld [vmem:[#allocation6] ss:$16 sps:$4 sm:$0xff]  }
 0x15b   :  { %1676 = vmatpush1.bf16.msra.mxu0 %v4927_v46  ;;  %1840 = vmatpush1.bf16.msra.mxu1 %v4930_v47  ;;  %v5023_v46 = vld [vmem:[#allocation6 + $0x8] ss:$16 sps:$4 sm:$0xff]   ;;  %v5028_v47 = vld [vmem:[#allocation6 + $0x24] ss:$16 sps:$4 sm:$0xff]  }
 0x15c   :  { %1677 = vmatprep.subr.bf16.mxu0 %v4935_v48  ;;  %1841 = vmatprep.subr.bf16.mxu1 %v4938_v49  ;;  %v5031_v48 = vld [vmem:[#allocation6 + $0x2c] ss:$16 sps:$4 sm:$0xff]   ;;  %v5026_v49 = vld [vmem:[#allocation6 + $0x20] ss:$16 sps:$4 sm:$0xff]  }
 0x15f   :  { %1678 = vmatpush1.bf16.msra.mxu0 %v4933_v50  ;;  %1842 = vmatpush1.bf16.msra.mxu1 %v4936_v51  ;;  %v5029_v50 = vld [vmem:[#allocation6 + $0x28] ss:$16 sps:$4 sm:$0xff]   ;;  %v5034_v51 = vld [vmem:[#allocation6 + $0x44] ss:$16 sps:$4 sm:$0xff]  }
 0x160   :  { %1679 = vmatprep.subr.bf16.mxu0 %v4941_v52  ;;  %1843 = vmatprep.subr.bf16.mxu1 %v4944_v53  ;;  %v5037_v52 = vld [vmem:[#allocation6 + $0x4c] ss:$16 sps:$4 sm:$0xff]   ;;  %v5032_v53 = vld [vmem:[#allocation6 + $0x40] ss:$16 sps:$4 sm:$0xff]  }
 0x163   :  { %1680 = vmatpush1.bf16.msra.mxu0 %v4939_v54  ;;  %1844 = vmatpush1.bf16.msra.mxu1 %v4942_v55  ;;  %v5035_v54 = vld [vmem:[#allocation6 + $0x48] ss:$16 sps:$4 sm:$0xff]   ;;  %v5040_v55 = vld [vmem:[#allocation6 + $0x64] ss:$16 sps:$4 sm:$0xff]  }
 0x164   :  { %1681 = vmatprep.subr.bf16.mxu0 %v4947_v56  ;;  %1845 = vmatprep.subr.bf16.mxu1 %v4950_v57  ;;  %v5043_v56 = vld [vmem:[#allocation6 + $0x6c] ss:$16 sps:$4 sm:$0xff]   ;;  %v5038_v57 = vld [vmem:[#allocation6 + $0x60] ss:$16 sps:$4 sm:$0xff]  }
 0x167   :  { %1682 = vmatpush1.bf16.msra.mxu0 %v4945_v58  ;;  %1846 = vmatpush1.bf16.msra.mxu1 %v4948_v59  ;;  %v5041_v58 = vld [vmem:[#allocation6 + $0x68] ss:$16 sps:$4 sm:$0xff]   ;;  %v5046_v59 = vld [vmem:[#allocation6 + $0x84] ss:$16 sps:$4 sm:$0xff]  }
 0x168   :  { %1683 = vmatprep.subr.bf16.mxu0 %v4953_v60  ;;  %1847 = vmatprep.subr.bf16.mxu1 %v4956_v61  ;;  %v5049_v60 = vld [vmem:[#allocation6 + $0x8c] ss:$16 sps:$4 sm:$0xff]   ;;  %v5044_v61 = vld [vmem:[#allocation6 + $0x80] ss:$16 sps:$4 sm:$0xff]  }
 0x16b   :  { %1684 = vmatpush1.bf16.msra.mxu0 %v4951_v62  ;;  %1848 = vmatpush1.bf16.msra.mxu1 %v4954_v63  ;;  %v5047_v62 = vld [vmem:[#allocation6 + $0x88] ss:$16 sps:$4 sm:$0xff]   ;;  %v5052_v63 = vld [vmem:[#allocation6 + $0xa4] ss:$16 sps:$4 sm:$0xff]  }
 0x16c   :  { %1685 = vmatprep.subr.bf16.mxu0 %v4959_v0  ;;  %1849 = vmatprep.subr.bf16.mxu1 %v4962_v1  ;;  %v5055_v0 = vld [vmem:[#allocation6 + $0xac] ss:$16 sps:$4 sm:$0xff]   ;;  %v5050_v1 = vld [vmem:[#allocation6 + $0xa0] ss:$16 sps:$4 sm:$0xff]  }
 0x16f   :  { %1686 = vmatpush1.bf16.msra.mxu0 %v4957_v2  ;;  %1850 = vmatpush1.bf16.msra.mxu1 %v4960_v3  ;;  %v5053_v2 = vld [vmem:[#allocation6 + $0xa8] ss:$16 sps:$4 sm:$0xff]   ;;  %v5058_v3 = vld [vmem:[#allocation6 + $0xc4] ss:$16 sps:$4 sm:$0xff]  }
 0x170   :  { %1687 = vmatprep.subr.bf16.mxu0 %v4965_v4  ;;  %1851 = vmatprep.subr.bf16.mxu1 %v4968_v5  ;;  %v5061_v4 = vld [vmem:[#allocation6 + $0xcc] ss:$16 sps:$4 sm:$0xff]   ;;  %v5056_v5 = vld [vmem:[#allocation6 + $0xc0] ss:$16 sps:$4 sm:$0xff]  }
 0x173   :  { %1688 = vmatpush1.bf16.msra.mxu0 %v4963_v6  ;;  %1852 = vmatpush1.bf16.msra.mxu1 %v4966_v7  ;;  %v5059_v6 = vld [vmem:[#allocation6 + $0xc8] ss:$16 sps:$4 sm:$0xff]   ;;  %v5064_v7 = vld [vmem:[#allocation6 + $0xe4] ss:$16 sps:$4 sm:$0xff]  }
 0x174   :  { %1698 = vmatprep.subr.bf16.mxu0 %v4973_v8  ;;  %1862 = vmatprep.subr.bf16.mxu1 %v4976_v9  ;;  %v5067_v8 = vld [vmem:[#allocation6 + $0xec] ss:$16 sps:$4 sm:$0xff]   ;;  %v5062_v9 = vld [vmem:[#allocation6 + $0xe0] ss:$16 sps:$4 sm:$0xff]  }
 0x176   :  { %1690 = vmatmul.mubr.bf16.vlgmr.msra.gmra.mrb[0].mxu0 %v4069_v13  ;;  %1854 = vmatmul.mubr.bf16.vlgmr.msra.gmra.mrb[0].mxu1 %v4069_v13  ;;  %v5073_v13 = vld [vmem:[#allocation6 + $0x10c] ss:$16 sps:$4 sm:$0xff]  }
 0x177   :  { %1699 = vmatpush1.bf16.msra.mxu0 %v4971_v10  ;;  %1863 = vmatpush1.bf16.msra.mxu1 %v4974_v12  ;;  %v5065_v10 = vld [vmem:[#allocation6 + $0xe8] ss:$16 sps:$4 sm:$0xff]   ;;  %v5070_v12 = vld [vmem:[#allocation6 + $0x104] ss:$16 sps:$4 sm:$0xff]  }
 0x178   :  { %1700 = vmatprep.subr.bf16.mxu0 %v4979_v14  ;;  %1864 = vmatprep.subr.bf16.mxu1 %v4982_v15  ;;  %v5068_v14 = vld [vmem:[#allocation6 + $0x100] ss:$16 sps:$4 sm:$0xff]   ;;  %v5071_v15 = vld [vmem:[#allocation6 + $0x108] ss:$16 sps:$4 sm:$0xff]  }
 0x179   :  { %1730 = vmatprep.mubr.bf16.mxu0 %v5656_v22  ;;  %1894 = vmatprep.mubr.bf16.mxu1 %v5656_v22 }
 0x17b   :  { %1701 = vmatpush1.bf16.msra.mxu0 %v4977_v16  ;;  %1865 = vmatpush1.bf16.msra.mxu1 %v4980_v17  ;;  %v5076_v16 = vld [vmem:[#allocation6 + $0x124] ss:$16 sps:$4 sm:$0xff]   ;;  %v5079_v17 = vld [vmem:[#allocation6 + $0x12c] ss:$16 sps:$4 sm:$0xff]  }
 0x17c   :  { %1702 = vmatprep.subr.bf16.mxu0 %v4985_v18  ;;  %1866 = vmatprep.subr.bf16.mxu1 %v4988_v19  ;;  %v5074_v18 = vld [vmem:[#allocation6 + $0x120] ss:$16 sps:$4 sm:$0xff]   ;;  %v5077_v19 = vld [vmem:[#allocation6 + $0x128] ss:$16 sps:$4 sm:$0xff]  }
 0x17f   :  { %1703 = vmatpush1.bf16.msra.mxu0 %v4983_v20  ;;  %1867 = vmatpush1.bf16.msra.mxu1 %v4986_v21  ;;  %v5082_v20 = vld [vmem:[#allocation6 + $0x144] ss:$16 sps:$4 sm:$0xff]   ;;  %v5085_v21 = vld [vmem:[#allocation6 + $0x14c] ss:$16 sps:$4 sm:$0xff]  }
 0x180   :  { %1704 = vmatprep.subr.bf16.mxu0 %v4991_v11  ;;  %1868 = vmatprep.subr.bf16.mxu1 %v4994_v23  ;;  %v5080_v11 = vld [vmem:[#allocation6 + $0x140] ss:$16 sps:$4 sm:$0xff]   ;;  %v5083_v23 = vld [vmem:[#allocation6 + $0x148] ss:$16 sps:$4 sm:$0xff]  }
 0x183   :  { %1705 = vmatpush1.bf16.msra.mxu0 %v4989_v24  ;;  %1869 = vmatpush1.bf16.msra.mxu1 %v4992_v25  ;;  %v5088_v24 = vld [vmem:[#allocation6 + $0x164] ss:$16 sps:$4 sm:$0xff]   ;;  %v5091_v25 = vld [vmem:[#allocation6 + $0x16c] ss:$16 sps:$4 sm:$0xff]  }
 0x184   :  { %1706 = vmatprep.subr.bf16.mxu0 %v4997_v26  ;;  %1870 = vmatprep.subr.bf16.mxu1 %v5000_v27  ;;  %v5086_v26 = vld [vmem:[#allocation6 + $0x160] ss:$16 sps:$4 sm:$0xff]   ;;  %v5089_v27 = vld [vmem:[#allocation6 + $0x168] ss:$16 sps:$4 sm:$0xff]  }
 0x187   :  { %1707 = vmatpush1.bf16.msra.mxu0 %v4995_v28  ;;  %1871 = vmatpush1.bf16.msra.mxu1 %v4998_v29  ;;  %v5094_v28 = vld [vmem:[#allocation6 + $0x184] ss:$16 sps:$4 sm:$0xff]   ;;  %v5097_v29 = vld [vmem:[#allocation6 + $0x18c] ss:$16 sps:$4 sm:$0xff]  }
 0x188   :  { %1708 = vmatprep.subr.bf16.mxu0 %v5003_v30  ;;  %1872 = vmatprep.subr.bf16.mxu1 %v5006_v31  ;;  %v5092_v30 = vld [vmem:[#allocation6 + $0x180] ss:$16 sps:$4 sm:$0xff]   ;;  %v5095_v31 = vld [vmem:[#allocation6 + $0x188] ss:$16 sps:$4 sm:$0xff]  }
 0x18b   :  { %1709 = vmatpush1.bf16.msra.mxu0 %v5001_v32  ;;  %1873 = vmatpush1.bf16.msra.mxu1 %v5004_v33  ;;  %v5100_v32 = vld [vmem:[#allocation6 + $0x1a4] ss:$16 sps:$4 sm:$0xff]   ;;  %v5103_v33 = vld [vmem:[#allocation6 + $0x1ac] ss:$16 sps:$4 sm:$0xff]  }
 0x18c   :  { %1710 = vmatprep.subr.bf16.mxu0 %v5009_v34  ;;  %1874 = vmatprep.subr.bf16.mxu1 %v5012_v35  ;;  %v5098_v34 = vld [vmem:[#allocation6 + $0x1a0] ss:$16 sps:$4 sm:$0xff]   ;;  %v5101_v35 = vld [vmem:[#allocation6 + $0x1a8] ss:$16 sps:$4 sm:$0xff]  }
 0x18f   :  { %1711 = vmatpush1.bf16.msra.mxu0 %v5007_v36  ;;  %1875 = vmatpush1.bf16.msra.mxu1 %v5010_v37  ;;  %v5106_v36 = vld [vmem:[#allocation6 + $0x1c4] ss:$16 sps:$4 sm:$0xff]   ;;  %v5109_v37 = vld [vmem:[#allocation6 + $0x1cc] ss:$16 sps:$4 sm:$0xff]  }
 0x190   :  { %1712 = vmatprep.subr.bf16.mxu0 %v5015_v38  ;;  %1876 = vmatprep.subr.bf16.mxu1 %v5018_v39  ;;  %v5104_v38 = vld [vmem:[#allocation6 + $0x1c0] ss:$16 sps:$4 sm:$0xff]   ;;  %v5107_v39 = vld [vmem:[#allocation6 + $0x1c8] ss:$16 sps:$4 sm:$0xff]  }
 0x193   :  { %1713 = vmatpush1.bf16.msra.mxu0 %v5013_v40  ;;  %1877 = vmatpush1.bf16.msra.mxu1 %v5016_v41  ;;  %v5112_v40 = vld [vmem:[#allocation6 + $0x1e4] ss:$16 sps:$4 sm:$0xff]   ;;  %v5115_v41 = vld [vmem:[#allocation6 + $0x1ec] ss:$16 sps:$4 sm:$0xff]  }
 0x194   :  { %2701 = vmatprep.subr.bf16.mxu0 %v5022_v42  ;;  %2783 = vmatprep.subr.bf16.mxu1 %v5025_v43  ;;  %v5110_v42 = vld [vmem:[#allocation6 + $0x1e0] ss:$16 sps:$4 sm:$0xff]   ;;  %v5113_v43 = vld [vmem:[#allocation6 + $0x1e8] ss:$16 sps:$4 sm:$0xff]  }
 0x196   :  { %1731 = vmatmul.mubr.bf16.vlgmr.msra.gmra.mrb[0].mxu0 %v5019_v44  ;;  %1895 = vmatmul.mubr.bf16.vlgmr.msra.gmra.mrb[0].mxu1 %v5019_v44  ;;  %v5118_v44 = vld [vmem:[#allocation6 + $0x204] ss:$16 sps:$4 sm:$0xff]  }
 0x197   :  { %2702 = vmatpush1.bf16.msra.mxu0 %v5020_v45  ;;  %2784 = vmatpush1.bf16.msra.mxu1 %v5023_v46  ;;  %v5121_v45 = vld [vmem:[#allocation6 + $0x20c] ss:$16 sps:$4 sm:$0xff]   ;;  %v410_v46 = vlaneseq }
 0x198   :  { %2703 = vmatprep.subr.bf16.mxu0 %v5028_v47  ;;  %2785 = vmatprep.subr.bf16.mxu1 %v5031_v48 }
 0x199   :  { %v5907_v47 = vshrl.u32 %v410_v46, 7  ;;  %v5173_v46 = vld [vmem:[#allocation6 + $0x328] ss:$16 sps:$4 sm:$0xff]  }
 0x19b   :  { %2704 = vmatpush1.bf16.msra.mxu0 %v5026_v49  ;;  %2786 = vmatpush1.bf16.msra.mxu1 %v5029_v50  ;;  %v5910_v48 = vsub.s32 0, %v5907_v47  ;;  %v5912_v49 = vld [vmem:[#allocation4] sm:$0xf]  ;;  %v5915_v50 = vsub.s32 1, %v5907_v47 }
 0x19c   :  { %2705 = vmatprep.subr.bf16.mxu0 %v5034_v51  ;;  %2787 = vmatprep.subr.bf16.mxu1 %v5037_v52  ;;  %v424_v51 = vsub.s32 3, %v5907_v47 }
 0x19d   :  { %v413_v52 = vrot.slane %v5912_v49, %v5910_v48 }
 0x19f   :  { %2706 = vmatpush1.bf16.msra.mxu0 %v5032_v53  ;;  %2788 = vmatpush1.bf16.msra.mxu1 %v5035_v54  ;;  %v417_v53 = vrot.slane %v5912_v49, %v5915_v50  ;;  %v425_v54 = vrot.slane %v5912_v49, %v424_v51 }
 0x1a0   :  { %2707 = vmatprep.subr.bf16.mxu0 %v5040_v55  ;;  %2789 = vmatprep.subr.bf16.mxu1 %v5043_v56 }
 0x1a3   :  { %2708 = vmatpush1.bf16.msra.mxu0 %v5038_v57  ;;  %2790 = vmatpush1.bf16.msra.mxu1 %v5041_v58 }
 0x1a4   :  { %2709 = vmatprep.subr.bf16.mxu0 %v5046_v59  ;;  %2791 = vmatprep.subr.bf16.mxu1 %v5049_v60 }
 0x1a7   :  { %2710 = vmatpush1.bf16.msra.mxu0 %v5044_v61  ;;  %2792 = vmatpush1.bf16.msra.mxu1 %v5047_v62 }
 0x1a8   :  { %2711 = vmatprep.subr.bf16.mxu0 %v5052_v63  ;;  %2793 = vmatprep.subr.bf16.mxu1 %v5055_v0 }
 0x1ab   :  { %2712 = vmatpush1.bf16.msra.mxu0 %v5050_v1  ;;  %2794 = vmatpush1.bf16.msra.mxu1 %v5053_v2 }
 0x1ac   :  { %2713 = vmatprep.subr.bf16.mxu0 %v5058_v3  ;;  %2795 = vmatprep.subr.bf16.mxu1 %v5061_v4 }
 0x1af   :  { %2714 = vmatpush1.bf16.msra.mxu0 %v5056_v5  ;;  %2796 = vmatpush1.bf16.msra.mxu1 %v5059_v6  ;;  %v5116_v6 = vld [vmem:[#allocation6 + $0x200] ss:$16 sps:$4 sm:$0xff]  }
 0x1b0   :  { %2715 = vmatprep.subr.bf16.mxu0 %v5064_v7  ;;  %2797 = vmatprep.subr.bf16.mxu1 %v5067_v8  ;;  %v5119_v7 = vld [vmem:[#allocation6 + $0x208] ss:$16 sps:$4 sm:$0xff]  }
 0x1b3   :  { %2716 = vmatpush1.bf16.msra.mxu0 %v5062_v9  ;;  %2798 = vmatpush1.bf16.msra.mxu1 %v5065_v10  ;;  %v5124_v9 = vld [vmem:[#allocation6 + $0x224] ss:$16 sps:$4 sm:$0xff]   ;;  %v5127_v10 = vld [vmem:[#allocation6 + $0x22c] ss:$16 sps:$4 sm:$0xff]  }
 0x1b4   :  { %2717 = vmatprep.subr.bf16.mxu0 %v5070_v12  ;;  %2799 = vmatprep.subr.bf16.mxu1 %v5073_v13  ;;  %v5122_v13 = vld [vmem:[#allocation6 + $0x220] ss:$16 sps:$4 sm:$0xff]  }
 0x1b7   :  { %2718 = vmatpush1.bf16.msra.mxu0 %v5068_v14  ;;  %2800 = vmatpush1.bf16.msra.mxu1 %v5071_v15  ;;  %v5125_v14 = vld [vmem:[#allocation6 + $0x228] ss:$16 sps:$4 sm:$0xff]   ;;  %v5130_v15 = vld [vmem:[#allocation6 + $0x244] ss:$16 sps:$4 sm:$0xff]  }
 0x1b8   :  { %2719 = vmatprep.subr.bf16.mxu0 %v5076_v16  ;;  %2801 = vmatprep.subr.bf16.mxu1 %v5079_v17  ;;  %v5133_v16 = vld [vmem:[#allocation6 + $0x24c] ss:$16 sps:$4 sm:$0xff]   ;;  %v5128_v17 = vld [vmem:[#allocation6 + $0x240] ss:$16 sps:$4 sm:$0xff]  }
 0x1bb   :  { %2720 = vmatpush1.bf16.msra.mxu0 %v5074_v18  ;;  %2802 = vmatpush1.bf16.msra.mxu1 %v5077_v19  ;;  %v5131_v18 = vld [vmem:[#allocation6 + $0x248] ss:$16 sps:$4 sm:$0xff]   ;;  %v5136_v19 = vld [vmem:[#allocation6 + $0x264] ss:$16 sps:$4 sm:$0xff]  }
 0x1bc   :  { %2721 = vmatprep.subr.bf16.mxu0 %v5082_v20  ;;  %2803 = vmatprep.subr.bf16.mxu1 %v5085_v21  ;;  %v5139_v20 = vld [vmem:[#allocation6 + $0x26c] ss:$16 sps:$4 sm:$0xff]   ;;  %v5134_v21 = vld [vmem:[#allocation6 + $0x260] ss:$16 sps:$4 sm:$0xff]  }
 0x1bf   :  { %2722 = vmatpush1.bf16.msra.mxu0 %v5080_v11  ;;  %2804 = vmatpush1.bf16.msra.mxu1 %v5083_v23  ;;  %v5137_v11 = vld [vmem:[#allocation6 + $0x268] ss:$16 sps:$4 sm:$0xff]   ;;  %v5142_v23 = vld [vmem:[#allocation6 + $0x284] ss:$16 sps:$4 sm:$0xff]  }
 0x1c0   :  { %2723 = vmatprep.subr.bf16.mxu0 %v5088_v24  ;;  %2805 = vmatprep.subr.bf16.mxu1 %v5091_v25  ;;  %v5145_v24 = vld [vmem:[#allocation6 + $0x28c] ss:$16 sps:$4 sm:$0xff]   ;;  %v5140_v25 = vld [vmem:[#allocation6 + $0x280] ss:$16 sps:$4 sm:$0xff]  }
 0x1c3   :  { %2724 = vmatpush1.bf16.msra.mxu0 %v5086_v26  ;;  %2806 = vmatpush1.bf16.msra.mxu1 %v5089_v27  ;;  %v5143_v26 = vld [vmem:[#allocation6 + $0x288] ss:$16 sps:$4 sm:$0xff]   ;;  %v5148_v27 = vld [vmem:[#allocation6 + $0x2a4] ss:$16 sps:$4 sm:$0xff]  }
 0x1c4   :  { %2725 = vmatprep.subr.bf16.mxu0 %v5094_v28  ;;  %2807 = vmatprep.subr.bf16.mxu1 %v5097_v29  ;;  %v5151_v28 = vld [vmem:[#allocation6 + $0x2ac] ss:$16 sps:$4 sm:$0xff]   ;;  %v5146_v29 = vld [vmem:[#allocation6 + $0x2a0] ss:$16 sps:$4 sm:$0xff]  }
 0x1c7   :  { %2726 = vmatpush1.bf16.msra.mxu0 %v5092_v30  ;;  %2808 = vmatpush1.bf16.msra.mxu1 %v5095_v31  ;;  %v5149_v30 = vld [vmem:[#allocation6 + $0x2a8] ss:$16 sps:$4 sm:$0xff]   ;;  %v5154_v31 = vld [vmem:[#allocation6 + $0x2c4] ss:$16 sps:$4 sm:$0xff]  }
 0x1c8   :  { %2727 = vmatprep.subr.bf16.mxu0 %v5100_v32  ;;  %2809 = vmatprep.subr.bf16.mxu1 %v5103_v33  ;;  %v5157_v32 = vld [vmem:[#allocation6 + $0x2cc] ss:$16 sps:$4 sm:$0xff]   ;;  %v5152_v33 = vld [vmem:[#allocation6 + $0x2c0] ss:$16 sps:$4 sm:$0xff]  }
 0x1cb   :  { %2728 = vmatpush1.bf16.msra.mxu0 %v5098_v34  ;;  %2810 = vmatpush1.bf16.msra.mxu1 %v5101_v35  ;;  %v5155_v34 = vld [vmem:[#allocation6 + $0x2c8] ss:$16 sps:$4 sm:$0xff]   ;;  %v5160_v35 = vld [vmem:[#allocation6 + $0x2e4] ss:$16 sps:$4 sm:$0xff]  }
 0x1cc   :  { %2729 = vmatprep.subr.bf16.mxu0 %v5106_v36  ;;  %2811 = vmatprep.subr.bf16.mxu1 %v5109_v37  ;;  %v5163_v36 = vld [vmem:[#allocation6 + $0x2ec] ss:$16 sps:$4 sm:$0xff]   ;;  %v5158_v37 = vld [vmem:[#allocation6 + $0x2e0] ss:$16 sps:$4 sm:$0xff]  }
 0x1cf   :  { %2730 = vmatpush1.bf16.msra.mxu0 %v5104_v38  ;;  %2812 = vmatpush1.bf16.msra.mxu1 %v5107_v39  ;;  %v5161_v38 = vld [vmem:[#allocation6 + $0x2e8] ss:$16 sps:$4 sm:$0xff]   ;;  %v5166_v39 = vld [vmem:[#allocation6 + $0x304] ss:$16 sps:$4 sm:$0xff]  }
 0x1d0   :  { %2731 = vmatprep.subr.bf16.mxu0 %v5112_v40  ;;  %2813 = vmatprep.subr.bf16.mxu1 %v5115_v41  ;;  %v5169_v40 = vld [vmem:[#allocation6 + $0x30c] ss:$16 sps:$4 sm:$0xff]   ;;  %v5164_v41 = vld [vmem:[#allocation6 + $0x300] ss:$16 sps:$4 sm:$0xff]  }
 0x1d3   :  { %2732 = vmatpush1.bf16.msra.mxu0 %v5110_v42  ;;  %2814 = vmatpush1.bf16.msra.mxu1 %v5113_v43  ;;  %v5167_v42 = vld [vmem:[#allocation6 + $0x308] ss:$16 sps:$4 sm:$0xff]   ;;  %v5172_v43 = vld [vmem:[#allocation6 + $0x324] ss:$16 sps:$4 sm:$0xff]  }
 0x1d4   :  { %2742 = vmatprep.subr.bf16.mxu0 %v5118_v44  ;;  %2824 = vmatprep.subr.bf16.mxu1 %v5121_v45  ;;  %v5175_v44 = vld [vmem:[#allocation6 + $0x32c] ss:$16 sps:$4 sm:$0xff]   ;;  %v5170_v45 = vld [vmem:[#allocation6 + $0x320] ss:$16 sps:$4 sm:$0xff]  }
 0x269   :  { %v1732_v55 = vpop.f32.mrb[0].mxu0  ;;  %v5925_v56 = vpop.f32.mrb[0].mxu1 }
 0x26a   :  { %v4614_v57 = vadd.f32 %v1732_v55, %v413_v52  ;;  %v1734_v58 = vpop.f32.mrb[1].mxu0  ;;  %v1898_v59 = vpop.f32.mrb[1].mxu1  ;;  %v5178_v52 = vld [vmem:[#allocation6 + $0x344] ss:$16 sps:$4 sm:$0xff]   ;;  %v5179_v55 = vld [vmem:[#allocation6 + $0x348] ss:$16 sps:$4 sm:$0xff]  }
 0x26b   :  { %v4615_v60 = vadd.f32 %v1734_v58, %v417_v53  ;;  %v4617_v61 = vadd.f32 %v1898_v59, %v425_v54  ;;  %v1736_v62 = vpop.f32.mrb[2].mxu0  ;;  %v1900_v63 = vpop.f32.mrb[2].mxu1  ;;  %v5181_v53 = vld [vmem:[#allocation6 + $0x34c] ss:$16 sps:$4 sm:$0xff]   ;;  %v5176_v54 = vld [vmem:[#allocation6 + $0x340] ss:$16 sps:$4 sm:$0xff]  }
 0x26c   :  { %v1903_v0 = vmax.f32 %v4614_v57, 0.0  ;;  %v1737_v1 = vpop.f32.mrb[3].mxu0  ;;  %v1901_v2 = vpop.f32.mrb[3].mxu1  ;;  %v5184_v57 = vld [vmem:[#allocation6 + $0x364] ss:$16 sps:$4 sm:$0xff]  }
 0x26d   :  { %v1904_v3 = vmax.f32 %v4615_v60, 0.0  ;;  %v1906_v4 = vmax.f32 %v4617_v61, 0.0  ;;  %v5187_v58 = vld [vmem:[#allocation6 + $0x36c] ss:$16 sps:$4 sm:$0xff]   ;;  %v5182_v59 = vld [vmem:[#allocation6 + $0x360] ss:$16 sps:$4 sm:$0xff]  }
 0x26e   :  { %v1907_v8 = vpack.c.bf16 %v1903_v0, %v1903_v0  ;;  %v5185_v60 = vld [vmem:[#allocation6 + $0x368] ss:$16 sps:$4 sm:$0xff]   ;;  %v5190_v61 = vld [vmem:[#allocation6 + $0x384] ss:$16 sps:$4 sm:$0xff]   ;;  %v5193_v62 = vld [vmem:[#allocation6 + $0x38c] ss:$16 sps:$4 sm:$0xff]  }
 0x26f   :  { %v1908_v5 = vpack.c.bf16 %v1904_v3, %v1904_v3  ;;  %v1910_v12 = vpack.c.bf16 %v1906_v4, %v1906_v4  ;;  %v5188_v63 = vld [vmem:[#allocation6 + $0x380] ss:$16 sps:$4 sm:$0xff]   ;;  %v5191_v0 = vld [vmem:[#allocation6 + $0x388] ss:$16 sps:$4 sm:$0xff]   ;;  %v420_v1 = vsub.s32 2, %v5907_v47 }
 0x270   :  { %v5196_v2 = vld [vmem:[#allocation6 + $0x3a4] ss:$16 sps:$4 sm:$0xff]   ;;  %v5199_v3 = vld [vmem:[#allocation6 + $0x3ac] ss:$16 sps:$4 sm:$0xff]   ;;  %v5194_v4 = vld [vmem:[#allocation6 + $0x3a0] ss:$16 sps:$4 sm:$0xff]  }
 0x271   :  { %2733 = vmatprep.mubr.bf16.mxu0 %v1908_v5  ;;  %2815 = vmatprep.mubr.bf16.mxu1 %v1908_v5  ;;  %v5197_v5 = vld [vmem:[#allocation6 + $0x3a8] ss:$16 sps:$4 sm:$0xff]  }
 0x272   :  { %2734 = vmatmul.mubr.bf16.vlgmr.msra.gmra.mrb[4].mxu0 %v1907_v8  ;;  %2816 = vmatmul.mubr.bf16.vlgmr.msra.gmra.mrb[4].mxu1 %v1907_v8  ;;  %v5205_v8 = vld [vmem:[#allocation6 + $0x3cc] ss:$16 sps:$4 sm:$0xff]   ;;  %v5352_v47 = vld [vmem:[#allocation10 + $0xe4] ss:$8 sps:$4 sm:$0xff]  }
 0x273   :  { %2743 = vmatpush1.bf16.msra.mxu0 %v5116_v6  ;;  %2825 = vmatpush1.bf16.msra.mxu1 %v5119_v7  ;;  %v421_v6 = vrot.slane %v5912_v49, %v420_v1  ;;  %v5202_v7 = vld [vmem:[#allocation6 + $0x3c4] ss:$16 sps:$4 sm:$0xff]   ;;  %v5214_v49 = vld [vmem:[#allocation9 + $0x4] ss:$8 sps:$4 sm:$0xff]  }
 0x274   :  { %2774 = vmatprep.mubr.bf16.mxu0 %v1910_v12  ;;  %2856 = vmatprep.mubr.bf16.mxu1 %v1910_v12 }
 0x275   :  { %2744 = vmatprep.subr.bf16.mxu0 %v5124_v9  ;;  %2826 = vmatprep.subr.bf16.mxu1 %v5127_v10  ;;  %v5200_v9 = vld [vmem:[#allocation6 + $0x3c0] ss:$16 sps:$4 sm:$0xff]   ;;  %v5203_v10 = vld [vmem:[#allocation6 + $0x3c8] ss:$16 sps:$4 sm:$0xff]   ;;  %v4616_v12 = vadd.f32 %v5925_v56, %v421_v6  ;;  %v5215_v56 = vld [vmem:[#allocation9 + $0x10] ss:$8 sps:$4 sm:$0xff]  }
 0x276   :  { %v5326_v6 = vld [vmem:[#allocation10 + $0x60] ss:$8 sps:$4 sm:$0xff]  }
 0x277   :  { %2745 = vmatpush1.bf16.msra.mxu0 %v5122_v13  ;;  %2827 = vmatpush1.bf16.msra.mxu1 %v5125_v14  ;;  %v5208_v13 = vld [vmem:[#allocation6 + $0x3e4] ss:$16 sps:$4 sm:$0xff]   ;;  %v5211_v14 = vld [vmem:[#allocation6 + $0x3ec] ss:$16 sps:$4 sm:$0xff]  }
 0x278   :  { %2746 = vmatprep.subr.bf16.mxu0 %v5130_v15  ;;  %2828 = vmatprep.subr.bf16.mxu1 %v5133_v16  ;;  %v5206_v15 = vld [vmem:[#allocation6 + $0x3e0] ss:$16 sps:$4 sm:$0xff]   ;;  %v5209_v16 = vld [vmem:[#allocation6 + $0x3e8] ss:$16 sps:$4 sm:$0xff]  }
 0x27b   :  { %2747 = vmatpush1.bf16.msra.mxu0 %v5128_v17  ;;  %2829 = vmatpush1.bf16.msra.mxu1 %v5131_v18  ;;  %v1905_v17 = vmax.f32 %v4616_v12, 0.0  ;;  %v5212_v18 = vld [vmem:[#allocation9] ss:$8 sps:$4 sm:$0xff]   ;;  %v5337_v12 = vld [vmem:[#allocation10 + $0x94] ss:$8 sps:$4 sm:$0xff]  }
 0x27c   :  { %2748 = vmatprep.subr.bf16.mxu0 %v5136_v19  ;;  %2830 = vmatprep.subr.bf16.mxu1 %v5139_v20  ;;  %v5217_v20 = vld [vmem:[#allocation9 + $0x14] ss:$8 sps:$4 sm:$0xff]  }
 0x27d   :  { %v1909_v19 = vpack.c.bf16 %v1905_v17, %v1905_v17  ;;  %v5341_v17 = vld [vmem:[#allocation10 + $0xb0] ss:$8 sps:$4 sm:$0xff]  }
 0x27f   :  { %2749 = vmatpush1.bf16.msra.mxu0 %v5134_v21  ;;  %2831 = vmatpush1.bf16.msra.mxu1 %v5137_v11  ;;  %v5220_v21 = vld [vmem:[#allocation9 + $0x24] ss:$8 sps:$4 sm:$0xff]   ;;  %v5218_v11 = vld [vmem:[#allocation9 + $0x20] ss:$8 sps:$4 sm:$0xff]  }
 0x280   :  { %2750 = vmatprep.subr.bf16.mxu0 %v5142_v23  ;;  %2832 = vmatprep.subr.bf16.mxu1 %v5145_v24  ;;  %v5223_v23 = vld [vmem:[#allocation9 + $0x34] ss:$8 sps:$4 sm:$0xff]   ;;  %v5221_v24 = vld [vmem:[#allocation9 + $0x30] ss:$8 sps:$4 sm:$0xff]  }
 0x283   :  { %2751 = vmatpush1.bf16.msra.mxu0 %v5140_v25  ;;  %2833 = vmatpush1.bf16.msra.mxu1 %v5143_v26  ;;  %v5226_v25 = vld [vmem:[#allocation9 + $0x44] ss:$8 sps:$4 sm:$0xff]   ;;  %v5224_v26 = vld [vmem:[#allocation9 + $0x40] ss:$8 sps:$4 sm:$0xff]  }
 0x284   :  { %2752 = vmatprep.subr.bf16.mxu0 %v5148_v27  ;;  %2834 = vmatprep.subr.bf16.mxu1 %v5151_v28  ;;  %v5229_v27 = vld [vmem:[#allocation9 + $0x54] ss:$8 sps:$4 sm:$0xff]   ;;  %v5227_v28 = vld [vmem:[#allocation9 + $0x50] ss:$8 sps:$4 sm:$0xff]  }
 0x287   :  { %2753 = vmatpush1.bf16.msra.mxu0 %v5146_v29  ;;  %2835 = vmatpush1.bf16.msra.mxu1 %v5149_v30  ;;  %v5232_v29 = vld [vmem:[#allocation9 + $0x64] ss:$8 sps:$4 sm:$0xff]   ;;  %v5230_v30 = vld [vmem:[#allocation9 + $0x60] ss:$8 sps:$4 sm:$0xff]  }
 0x288   :  { %2754 = vmatprep.subr.bf16.mxu0 %v5154_v31  ;;  %2836 = vmatprep.subr.bf16.mxu1 %v5157_v32  ;;  %v5235_v31 = vld [vmem:[#allocation9 + $0x74] ss:$8 sps:$4 sm:$0xff]   ;;  %v5233_v32 = vld [vmem:[#allocation9 + $0x70] ss:$8 sps:$4 sm:$0xff]  }
 0x28b   :  { %2755 = vmatpush1.bf16.msra.mxu0 %v5152_v33  ;;  %2837 = vmatpush1.bf16.msra.mxu1 %v5155_v34  ;;  %v5238_v33 = vld [vmem:[#allocation9 + $0x84] ss:$8 sps:$4 sm:$0xff]   ;;  %v5236_v34 = vld [vmem:[#allocation9 + $0x80] ss:$8 sps:$4 sm:$0xff]  }
 0x28c   :  { %2756 = vmatprep.subr.bf16.mxu0 %v5160_v35  ;;  %2838 = vmatprep.subr.bf16.mxu1 %v5163_v36  ;;  %v5241_v35 = vld [vmem:[#allocation9 + $0x94] ss:$8 sps:$4 sm:$0xff]   ;;  %v5239_v36 = vld [vmem:[#allocation9 + $0x90] ss:$8 sps:$4 sm:$0xff]  }
 0x28f   :  { %2757 = vmatpush1.bf16.msra.mxu0 %v5158_v37  ;;  %2839 = vmatpush1.bf16.msra.mxu1 %v5161_v38  ;;  %v5244_v37 = vld [vmem:[#allocation9 + $0xa4] ss:$8 sps:$4 sm:$0xff]   ;;  %v5242_v38 = vld [vmem:[#allocation9 + $0xa0] ss:$8 sps:$4 sm:$0xff]  }
 0x290   :  { %2758 = vmatprep.subr.bf16.mxu0 %v5166_v39  ;;  %2840 = vmatprep.subr.bf16.mxu1 %v5169_v40  ;;  %v5247_v39 = vld [vmem:[#allocation9 + $0xb4] ss:$8 sps:$4 sm:$0xff]   ;;  %v5245_v40 = vld [vmem:[#allocation9 + $0xb0] ss:$8 sps:$4 sm:$0xff]  }
 0x293   :  { %2759 = vmatpush1.bf16.msra.mxu0 %v5164_v41  ;;  %2841 = vmatpush1.bf16.msra.mxu1 %v5167_v42  ;;  %v5250_v41 = vld [vmem:[#allocation9 + $0xc4] ss:$8 sps:$4 sm:$0xff]   ;;  %v5248_v42 = vld [vmem:[#allocation9 + $0xc0] ss:$8 sps:$4 sm:$0xff]  }
 0x294   :  { %2760 = vmatprep.subr.bf16.mxu0 %v5172_v43  ;;  %2842 = vmatprep.subr.bf16.mxu1 %v5175_v44  ;;  %v5253_v43 = vld [vmem:[#allocation9 + $0xd4] ss:$8 sps:$4 sm:$0xff]   ;;  %v5251_v44 = vld [vmem:[#allocation9 + $0xd0] ss:$8 sps:$4 sm:$0xff]  }
 0x297   :  { %2761 = vmatpush1.bf16.msra.mxu0 %v5170_v45  ;;  %2843 = vmatpush1.bf16.msra.mxu1 %v5173_v46  ;;  %v5256_v45 = vld [vmem:[#allocation9 + $0xe4] ss:$8 sps:$4 sm:$0xff]   ;;  %v5254_v46 = vld [vmem:[#allocation9 + $0xe0] ss:$8 sps:$4 sm:$0xff]  }
 0x298   :  { %2762 = vmatprep.subr.bf16.mxu0 %v5178_v52  ;;  %2844 = vmatprep.subr.bf16.mxu1 %v5181_v53  ;;  %v5259_v52 = vld [vmem:[#allocation9 + $0xf4] ss:$8 sps:$4 sm:$0xff]   ;;  %v5257_v53 = vld [vmem:[#allocation9 + $0xf0] ss:$8 sps:$4 sm:$0xff]  }
 0x29b   :  { %2763 = vmatpush1.bf16.msra.mxu0 %v5176_v54  ;;  %2845 = vmatpush1.bf16.msra.mxu1 %v5179_v55  ;;  %v5262_v54 = vld [vmem:[#allocation9 + $0x104] ss:$8 sps:$4 sm:$0xff]   ;;  %v5308_v55 = vld [vmem:[#allocation10] ss:$8 sps:$4 sm:$0xff]  }
 0x29c   :  { %2764 = vmatprep.subr.bf16.mxu0 %v5184_v57  ;;  %2846 = vmatprep.subr.bf16.mxu1 %v5187_v58  ;;  %v5310_v57 = vld [vmem:[#allocation10 + $0x4] ss:$8 sps:$4 sm:$0xff]   ;;  %v5313_v58 = vld [vmem:[#allocation10 + $0x14] ss:$8 sps:$4 sm:$0xff]  }
 0x29f   :  { %2765 = vmatpush1.bf16.msra.mxu0 %v5182_v59  ;;  %2847 = vmatpush1.bf16.msra.mxu1 %v5185_v60  ;;  %v5311_v59 = vld [vmem:[#allocation10 + $0x10] ss:$8 sps:$4 sm:$0xff]   ;;  %v5316_v60 = vld [vmem:[#allocation10 + $0x24] ss:$8 sps:$4 sm:$0xff]  }
 0x2a0   :  { %2766 = vmatprep.subr.bf16.mxu0 %v5190_v61  ;;  %2848 = vmatprep.subr.bf16.mxu1 %v5193_v62  ;;  %v5314_v61 = vld [vmem:[#allocation10 + $0x20] ss:$8 sps:$4 sm:$0xff]   ;;  %v5319_v62 = vld [vmem:[#allocation10 + $0x34] ss:$8 sps:$4 sm:$0xff]  }
 0x2a3   :  { %2767 = vmatpush1.bf16.msra.mxu0 %v5188_v63  ;;  %2849 = vmatpush1.bf16.msra.mxu1 %v5191_v0  ;;  %v5317_v63 = vld [vmem:[#allocation10 + $0x30] ss:$8 sps:$4 sm:$0xff]   ;;  %v5322_v0 = vld [vmem:[#allocation10 + $0x44] ss:$8 sps:$4 sm:$0xff]  }
 0x2a4   :  { %2768 = vmatprep.subr.bf16.mxu0 %v5196_v2  ;;  %2850 = vmatprep.subr.bf16.mxu1 %v5199_v3  ;;  %v5320_v2 = vld [vmem:[#allocation10 + $0x40] ss:$8 sps:$4 sm:$0xff]   ;;  %v5325_v3 = vld [vmem:[#allocation10 + $0x54] ss:$8 sps:$4 sm:$0xff]  }
 0x2a7   :  { %2769 = vmatpush1.bf16.msra.mxu0 %v5194_v4  ;;  %2851 = vmatpush1.bf16.msra.mxu1 %v5197_v5  ;;  %v5323_v4 = vld [vmem:[#allocation10 + $0x50] ss:$8 sps:$4 sm:$0xff]   ;;  %v5328_v5 = vld [vmem:[#allocation10 + $0x64] ss:$8 sps:$4 sm:$0xff]  }
 0x2a8   :  { %2770 = vmatprep.subr.bf16.mxu0 %v5202_v7  ;;  %2852 = vmatprep.subr.bf16.mxu1 %v5205_v8  ;;  %v5331_v7 = vld [vmem:[#allocation10 + $0x74] ss:$8 sps:$4 sm:$0xff]   ;;  %v5329_v8 = vld [vmem:[#allocation10 + $0x70] ss:$8 sps:$4 sm:$0xff]  }
 0x2ab   :  { %2771 = vmatpush1.bf16.msra.mxu0 %v5200_v9  ;;  %2853 = vmatpush1.bf16.msra.mxu1 %v5203_v10  ;;  %v5334_v9 = vld [vmem:[#allocation10 + $0x84] ss:$8 sps:$4 sm:$0xff]   ;;  %v5332_v10 = vld [vmem:[#allocation10 + $0x80] ss:$8 sps:$4 sm:$0xff]  }
 0x2ac   :  { %2772 = vmatprep.subr.bf16.mxu0 %v5208_v13  ;;  %2854 = vmatprep.subr.bf16.mxu1 %v5211_v14  ;;  %v5335_v13 = vld [vmem:[#allocation10 + $0x90] ss:$8 sps:$4 sm:$0xff]   ;;  %v5340_v14 = vld [vmem:[#allocation10 + $0xa4] ss:$8 sps:$4 sm:$0xff]  }
 0x2af   :  { %2773 = vmatpush1.bf16.msra.mxu0 %v5206_v15  ;;  %2855 = vmatpush1.bf16.msra.mxu1 %v5209_v16  ;;  %v5338_v15 = vld [vmem:[#allocation10 + $0xa0] ss:$8 sps:$4 sm:$0xff]   ;;  %v5343_v16 = vld [vmem:[#allocation10 + $0xb4] ss:$8 sps:$4 sm:$0xff]  }
 0x2b0   :  { %3269 = vmatprep.subr.bf16.mxu0 %v5214_v49  ;;  %3559 = vmatprep.subr.bf16.mxu1 %v5310_v57  ;;  %v5346_v49 = vld [vmem:[#allocation10 + $0xc4] ss:$8 sps:$4 sm:$0xff]  }
 0x2b1   :  { %v5280_v57 = vld [vmem:[#allocation9 + $0x164] ss:$8 sps:$4 sm:$0xff]  }
 0x2b2   :  { %2775 = vmatmul.mubr.bf16.vlgmr.msra.gmra.mrb[4].mxu0 %v1909_v19  ;;  %2857 = vmatmul.mubr.bf16.vlgmr.msra.gmra.mrb[4].mxu1 %v1909_v19  ;;  %v5349_v19 = vld [vmem:[#allocation10 + $0xd4] ss:$8 sps:$4 sm:$0xff]  }
 0x2b3   :  { %3270 = vmatpush1.bf16.msra.mxu0 %v5212_v18  ;;  %3560 = vmatpush1.bf16.msra.mxu1 %v5308_v55  ;;  %v5344_v18 = vld [vmem:[#allocation10 + $0xc0] ss:$8 sps:$4 sm:$0xff]   ;;  %v5275_v55 = vld [vmem:[#allocation9 + $0x150] ss:$8 sps:$4 sm:$0xff]  }
 0x2b4   :  { %3271 = vmatprep.subr.bf16.mxu0 %v5217_v20  ;;  %3561 = vmatprep.subr.bf16.mxu1 %v5313_v58  ;;  %v5932_v20 = vld [vmem:[#allocation7] sm:$0xf]  ;;  %v5278_v58 = vld [vmem:[#allocation9 + $0x160] ss:$8 sps:$4 sm:$0xff]  }
 0x2b7   :  { %3272 = vmatpush1.bf16.msra.mxu0 %v5215_v56  ;;  %3562 = vmatpush1.bf16.msra.mxu1 %v5311_v59  ;;  %v5347_v56 = vld [vmem:[#allocation10 + $0xd0] ss:$8 sps:$4 sm:$0xff]   ;;  %v5283_v59 = vld [vmem:[#allocation9 + $0x174] ss:$8 sps:$4 sm:$0xff]  }
 0x2b8   :  { %3273 = vmatprep.subr.bf16.mxu0 %v5220_v21  ;;  %3563 = vmatprep.subr.bf16.mxu1 %v5316_v60  ;;  %v2044_v21 = vrot.slane %v5932_v20, %v5910_v48  ;;  %v5281_v60 = vld [vmem:[#allocation9 + $0x170] ss:$8 sps:$4 sm:$0xff]  }
 0x2bb   :  { %3274 = vmatpush1.bf16.msra.mxu0 %v5218_v11  ;;  %3564 = vmatpush1.bf16.msra.mxu1 %v5314_v61  ;;  %v2048_v11 = vrot.slane %v5932_v20, %v5915_v50  ;;  %v5286_v61 = vld [vmem:[#allocation9 + $0x184] ss:$8 sps:$4 sm:$0xff]  }
 0x2bc   :  { %3275 = vmatprep.subr.bf16.mxu0 %v5223_v23  ;;  %3565 = vmatprep.subr.bf16.mxu1 %v5319_v62  ;;  %v2056_v23 = vrot.slane %v5932_v20, %v424_v51  ;;  %v5265_v51 = vld [vmem:[#allocation9 + $0x114] ss:$8 sps:$4 sm:$0xff]   ;;  %v5284_v62 = vld [vmem:[#allocation9 + $0x180] ss:$8 sps:$4 sm:$0xff]  }
 0x2bf   :  { %3276 = vmatpush1.bf16.msra.mxu0 %v5221_v24  ;;  %3566 = vmatpush1.bf16.msra.mxu1 %v5317_v63  ;;  %v5289_v63 = vld [vmem:[#allocation9 + $0x194] ss:$8 sps:$4 sm:$0xff]  }
 0x2c0   :  { %3277 = vmatprep.subr.bf16.mxu0 %v5226_v25  ;;  %3567 = vmatprep.subr.bf16.mxu1 %v5322_v0  ;;  %v5287_v0 = vld [vmem:[#allocation9 + $0x190] ss:$8 sps:$4 sm:$0xff]  }
 0x2c3   :  { %3278 = vmatpush1.bf16.msra.mxu0 %v5224_v26  ;;  %3568 = vmatpush1.bf16.msra.mxu1 %v5320_v2  ;;  %v5292_v2 = vld [vmem:[#allocation9 + $0x1a4] ss:$8 sps:$4 sm:$0xff]  }
 0x2c4   :  { %3279 = vmatprep.subr.bf16.mxu0 %v5229_v27  ;;  %3569 = vmatprep.subr.bf16.mxu1 %v5325_v3  ;;  %v5290_v3 = vld [vmem:[#allocation9 + $0x1a0] ss:$8 sps:$4 sm:$0xff]  }
 0x2c7   :  { %3280 = vmatpush1.bf16.msra.mxu0 %v5227_v28  ;;  %3570 = vmatpush1.bf16.msra.mxu1 %v5323_v4  ;;  %v5295_v4 = vld [vmem:[#allocation9 + $0x1b4] ss:$8 sps:$4 sm:$0xff]  }
 0x2c8   :  { %3281 = vmatprep.subr.bf16.mxu0 %v5232_v29  ;;  %3571 = vmatprep.subr.bf16.mxu1 %v5328_v5  ;;  %v5293_v5 = vld [vmem:[#allocation9 + $0x1b0] ss:$8 sps:$4 sm:$0xff]  }
 0x2cb   :  { %3282 = vmatpush1.bf16.msra.mxu0 %v5230_v30  ;;  %3572 = vmatpush1.bf16.msra.mxu1 %v5326_v6  ;;  %v5298_v6 = vld [vmem:[#allocation9 + $0x1c4] ss:$8 sps:$4 sm:$0xff]  }
 0x2cc   :  { %3283 = vmatprep.subr.bf16.mxu0 %v5235_v31  ;;  %3573 = vmatprep.subr.bf16.mxu1 %v5331_v7  ;;  %v5296_v7 = vld [vmem:[#allocation9 + $0x1c0] ss:$8 sps:$4 sm:$0xff]  }
 0x2cf   :  { %3284 = vmatpush1.bf16.msra.mxu0 %v5233_v32  ;;  %3574 = vmatpush1.bf16.msra.mxu1 %v5329_v8  ;;  %v5301_v8 = vld [vmem:[#allocation9 + $0x1d4] ss:$8 sps:$4 sm:$0xff]  }
 0x2d0   :  { %3285 = vmatprep.subr.bf16.mxu0 %v5238_v33  ;;  %3575 = vmatprep.subr.bf16.mxu1 %v5334_v9  ;;  %v5299_v9 = vld [vmem:[#allocation9 + $0x1d0] ss:$8 sps:$4 sm:$0xff]  }
 0x2d3   :  { %3286 = vmatpush1.bf16.msra.mxu0 %v5236_v34  ;;  %3576 = vmatpush1.bf16.msra.mxu1 %v5332_v10  ;;  %v2052_v10 = vrot.slane %v5932_v20, %v420_v1  ;;  %v5355_v1 = vld [vmem:[#allocation10 + $0xf4] ss:$8 sps:$4 sm:$0xff]  }
 0x2d4   :  { %3287 = vmatprep.subr.bf16.mxu0 %v5241_v35  ;;  %3577 = vmatprep.subr.bf16.mxu1 %v5337_v12  ;;  %v5304_v12 = vld [vmem:[#allocation9 + $0x1e4] ss:$8 sps:$4 sm:$0xff]   ;;  %v5356_v20 = vld [vmem:[%s6048_s10 + $0x40] sm:$0xff]  }
 0x2d7   :  { %3288 = vmatpush1.bf16.msra.mxu0 %v5239_v36  ;;  %3578 = vmatpush1.bf16.msra.mxu1 %v5335_v13  ;;  %v5302_v13 = vld [vmem:[#allocation9 + $0x1e0] ss:$8 sps:$4 sm:$0xff]  }
 0x2d8   :  { %3289 = vmatprep.subr.bf16.mxu0 %v5244_v37  ;;  %3579 = vmatprep.subr.bf16.mxu1 %v5340_v14 }
 0x2db   :  { %3290 = vmatpush1.bf16.msra.mxu0 %v5242_v38  ;;  %3580 = vmatpush1.bf16.msra.mxu1 %v5338_v15  ;;  %v5307_v15 = vld [vmem:[#allocation9 + $0x1f4] ss:$8 sps:$4 sm:$0xff]  }
 0x2dc   :  { %3291 = vmatprep.subr.bf16.mxu0 %v5247_v39  ;;  %3581 = vmatprep.subr.bf16.mxu1 %v5343_v16  ;;  %v5260_v39 = vld [vmem:[#allocation9 + $0x100] ss:$8 sps:$4 sm:$0xff]   ;;  %v5305_v16 = vld [vmem:[#allocation9 + $0x1f0] ss:$8 sps:$4 sm:$0xff]  }
 0x2df   :  { %3292 = vmatpush1.bf16.msra.mxu0 %v5245_v40  ;;  %3582 = vmatpush1.bf16.msra.mxu1 %v5341_v17 }
 0x2e0   :  { %3293 = vmatprep.subr.bf16.mxu0 %v5250_v41  ;;  %3583 = vmatprep.subr.bf16.mxu1 %v5346_v49 }
 0x2e3   :  { %3294 = vmatpush1.bf16.msra.mxu0 %v5248_v42  ;;  %3584 = vmatpush1.bf16.msra.mxu1 %v5344_v18  ;;  %v5263_v42 = vld [vmem:[#allocation9 + $0x110] ss:$8 sps:$4 sm:$0xff]   ;;  %v5350_v18 = vld [vmem:[#allocation10 + $0xe0] ss:$8 sps:$4 sm:$0xff]  }
 0x2e4   :  { %3295 = vmatprep.subr.bf16.mxu0 %v5253_v43  ;;  %3585 = vmatprep.subr.bf16.mxu1 %v5349_v19  ;;  %v5268_v43 = vld [vmem:[#allocation9 + $0x124] ss:$8 sps:$4 sm:$0xff]   ;;  %v5353_v19 = vld [vmem:[#allocation10 + $0xf0] ss:$8 sps:$4 sm:$0xff]  }
 0x2e7   :  { %3296 = vmatpush1.bf16.msra.mxu0 %v5251_v44  ;;  %3586 = vmatpush1.bf16.msra.mxu1 %v5347_v56  ;;  %v5266_v44 = vld [vmem:[#allocation9 + $0x120] ss:$8 sps:$4 sm:$0xff]   ;;  %v2937_v56 = vld [vmem:[%s6045_s7] sm:$0x3] }
 0x2e8   :  { %3297 = vmatprep.subr.bf16.mxu0 %v5256_v45  ;;  %v5271_v45 = vld [vmem:[#allocation9 + $0x134] ss:$8 sps:$4 sm:$0xff]   ;;  %3587 = vmatprep.subr.bf16.mxu1 %v5352_v47 }
 0x2eb   :  { %3298 = vmatpush1.bf16.msra.mxu0 %v5254_v46  ;;  %v5269_v46 = vld [vmem:[#allocation9 + $0x130] ss:$8 sps:$4 sm:$0xff]   ;;  %3588 = vmatpush1.bf16.msra.mxu1 %v5350_v18 }
 0x2ec   :  { %3299 = vmatprep.subr.bf16.mxu0 %v5259_v52  ;;  %v5274_v52 = vld [vmem:[#allocation9 + $0x144] ss:$8 sps:$4 sm:$0xff]   ;;  %3589 = vmatprep.subr.bf16.mxu1 %v5355_v1 }
 0x2ef   :  { %3300 = vmatpush1.bf16.msra.mxu0 %v5257_v53  ;;  %v5272_v53 = vld [vmem:[#allocation9 + $0x140] ss:$8 sps:$4 sm:$0xff]   ;;  %3590 = vmatpush1.bf16.msra.mxu1 %v5353_v19 }
 0x2f0   :  { %3310 = vmatprep.subr.bf16.mxu0 %v5262_v54  ;;  %v5277_v54 = vld [vmem:[#allocation9 + $0x154] ss:$8 sps:$4 sm:$0xff]   ;;  %4563 = vmatprep.subr.bf16.mxu1 %v5356_v20  ;;  %v5385_v20 = vld [vmem:[#allocation15 + $0x14] ss:$8 sps:$4 sm:$0xff]  }
 0x385   :  { %v2776_v24 = vpop.f32.mrb[4].mxu0  ;;  %v5941_v25 = vpop.f32.mrb[4].mxu1 }
 0x386   :  { %v4618_v26 = vadd.f32 %v2776_v24, %v2044_v21  ;;  %v2778_v27 = vpop.f32.mrb[5].mxu0  ;;  %v2860_v28 = vpop.f32.mrb[5].mxu1  ;;  %v4620_v14 = vadd.f32 %v5941_v25, %v2052_v10  ;;  %v2942_v21 = vrot.slane %v2937_v56, %v5910_v48  ;;  %v5379_v10 = vld [vmem:[%s6050_s12 + $0x38] sm:$0xff]  }
 0x387   :  { %v4619_v29 = vadd.f32 %v2778_v27, %v2048_v11  ;;  %v4621_v30 = vadd.f32 %v2860_v28, %v2056_v23  ;;  %v2780_v31 = vpop.f32.mrb[6].mxu0  ;;  %v2862_v32 = vpop.f32.mrb[6].mxu1 }
 0x388   :  { %v2865_v33 = vmax.f32 %v4618_v26, 0.0  ;;  %v2781_v34 = vpop.f32.mrb[7].mxu0  ;;  %v2863_v35 = vpop.f32.mrb[7].mxu1  ;;  %v2867_v17 = vmax.f32 %v4620_v14, 0.0  ;;  %v5357_v31 = vld [vmem:[%s6048_s10] sm:$0xff]  }
 0x389   :  { %v2866_v36 = vmax.f32 %v4619_v29, 0.0  ;;  %v2868_v37 = vmax.f32 %v4621_v30, 0.0  ;;  %v5359_v34 = vld [vmem:[%s6048_s10 + $0x8] sm:$0xff]   ;;  %v5360_v35 = vld [vmem:[%s6048_s10 + $0x50] sm:$0xff]  }
 0x38a   :  { %v2869_v40 = vpack.c.bf16 %v2865_v33, %v2865_v33  ;;  %v2871_v49 = vpack.c.bf16 %v2867_v17, %v2867_v17  ;;  %v5358_v33 = vld [vmem:[%s6048_s10 + $0x48] sm:$0xff]  }
 0x38b   :  { %v2870_v38 = vpack.c.bf16 %v2866_v36, %v2866_v36  ;;  %v2872_v41 = vpack.c.bf16 %v2868_v37, %v2868_v37  ;;  %v5361_v36 = vld [vmem:[%s6048_s10 + $0x10] sm:$0xff]   ;;  %v5362_v37 = vld [vmem:[%s6048_s10 + $0x58] sm:$0xff]  }
 0x38d   :  { %3301 = vmatprep.mubr.bf16.mxu0 %v2870_v38  ;;  %v5363_v38 = vld [vmem:[%s6048_s10 + $0x18] sm:$0xff]  }
 0x38e   :  { %3302 = vmatmul.mubr.bf16.vlgmr.msra.gmra.mrb[8].mxu0 %v2869_v40  ;;  %v5365_v40 = vld [vmem:[%s6048_s10 + $0x20] sm:$0xff]  }
 0x38f   :  { %3311 = vmatpush1.bf16.msra.mxu0 %v5260_v39  ;;  %3342 = vmatprep.mubr.bf16.mxu0 %v2872_v41  ;;  %v5364_v39 = vld [vmem:[%s6048_s10 + $0x60] sm:$0xff]   ;;  %v5367_v41 = vld [vmem:[%s6048_s10 + $0x28] sm:$0xff]  }
 0x390   :  { %3312 = vmatprep.subr.bf16.mxu0 %v5265_v51  ;;  %v5366_v51 = vld [vmem:[%s6048_s10 + $0x68] sm:$0xff]  }
 0x393   :  { %3313 = vmatpush1.bf16.msra.mxu0 %v5263_v42  ;;  %v5368_v42 = vld [vmem:[%s6048_s10 + $0x70] sm:$0xff]  }
 0x394   :  { %3314 = vmatprep.subr.bf16.mxu0 %v5268_v43  ;;  %v5369_v43 = vld [vmem:[%s6048_s10 + $0x30] sm:$0xff]  }
 0x397   :  { %3315 = vmatpush1.bf16.msra.mxu0 %v5266_v44  ;;  %v5370_v44 = vld [vmem:[%s6048_s10 + $0x78] sm:$0xff]  }
 0x398   :  { %3316 = vmatprep.subr.bf16.mxu0 %v5271_v45  ;;  %v5371_v45 = vld [vmem:[%s6048_s10 + $0x38] sm:$0xff]  }
 0x39b   :  { %3317 = vmatpush1.bf16.msra.mxu0 %v5269_v46  ;;  %v5657_v46 = vmov 0.0  }
 0x39c   :  { %3318 = vmatprep.subr.bf16.mxu0 %v5274_v52  ;;  %v3387_v52 = vld [vmem:[#allocation12] sm:$0x3] }
 0x39f   :  { %3319 = vmatpush1.bf16.msra.mxu0 %v5272_v53  ;;  %v3392_v53 = vrot.slane %v3387_v52, %v5910_v48 }
 0x3a0   :  { %3320 = vmatprep.subr.bf16.mxu0 %v5277_v54  ;;  %v3396_v54 = vrot.slane %v3387_v52, %v5915_v50 }
 0x3a3   :  { %3321 = vmatpush1.bf16.msra.mxu0 %v5275_v55 }
 0x3a4   :  { %3322 = vmatprep.subr.bf16.mxu0 %v5280_v57 }
 0x3a7   :  { %3323 = vmatpush1.bf16.msra.mxu0 %v5278_v58 }
 0x3a8   :  { %3324 = vmatprep.subr.bf16.mxu0 %v5283_v59 }
 0x3ab   :  { %3325 = vmatpush1.bf16.msra.mxu0 %v5281_v60 }
 0x3ac   :  { %3326 = vmatprep.subr.bf16.mxu0 %v5286_v61 }
 0x3af   :  { %3327 = vmatpush1.bf16.msra.mxu0 %v5284_v62 }
 0x3b0   :  { %3328 = vmatprep.subr.bf16.mxu0 %v5289_v63 }
 0x3b3   :  { %3329 = vmatpush1.bf16.msra.mxu0 %v5287_v0 }
 0x3b4   :  { %3330 = vmatprep.subr.bf16.mxu0 %v5292_v2  ;;  %v5372_v2 = vld [vmem:[%s6050_s12] sm:$0xff]  }
 0x3b7   :  { %3331 = vmatpush1.bf16.msra.mxu0 %v5290_v3 }
 0x3b8   :  { %3332 = vmatprep.subr.bf16.mxu0 %v5295_v4  ;;  %v5373_v4 = vld [vmem:[%s6050_s12 + $0x8] sm:$0xff]  }
 0x3bb   :  { %3333 = vmatpush1.bf16.msra.mxu0 %v5293_v5  ;;  %v5374_v5 = vld [vmem:[%s6050_s12 + $0x10] sm:$0xff]  }
 0x3bc   :  { %3334 = vmatprep.subr.bf16.mxu0 %v5298_v6  ;;  %v5375_v6 = vld [vmem:[%s6050_s12 + $0x18] sm:$0xff]  }
 0x3bf   :  { %3335 = vmatpush1.bf16.msra.mxu0 %v5296_v7  ;;  %v5376_v7 = vld [vmem:[%s6050_s12 + $0x20] sm:$0xff]  }
 0x3c0   :  { %3336 = vmatprep.subr.bf16.mxu0 %v5301_v8  ;;  %v5377_v8 = vld [vmem:[%s6050_s12 + $0x28] sm:$0xff]  }
 0x3c3   :  { %3337 = vmatpush1.bf16.msra.mxu0 %v5299_v9  ;;  %v5378_v9 = vld [vmem:[%s6050_s12 + $0x30] sm:$0xff]  }
 0x3c4   :  { %3338 = vmatprep.subr.bf16.mxu0 %v5304_v12  ;;  %v5380_v12 = vld [vmem:[#allocation15] ss:$8 sps:$4 sm:$0xff]  }
 0x3c7   :  { %3339 = vmatpush1.bf16.msra.mxu0 %v5302_v13  ;;  %v5382_v13 = vld [vmem:[#allocation15 + $0x4] ss:$8 sps:$4 sm:$0xff]  }
 0x3c8   :  { %3340 = vmatprep.subr.bf16.mxu0 %v5307_v15  ;;  %v4520_v15 = vld [vmem:[#allocation13] ss:$0 sm:$0xff] }
 0x3cb   :  { %3341 = vmatpush1.bf16.msra.mxu0 %v5305_v16 }
 0x3cc   :  { %4007 = vmatprep.subr.bf16.mxu0 %v5382_v13 }
 0x3ce   :  { %3343 = vmatmul.mubr.bf16.vlgmr.msra.gmra.mrb[8].mxu0 %v2871_v49 }
 0x3cf   :  { %4039 = vmatprep.mubr.bf16.mxu0 %v5656_v22  ;;  %v2946_v22 = vrot.slane %v2937_v56, %v5915_v50  ;;  %4008 = vmatpush1.bf16.msra.mxu0 %v5380_v12  ;;  %v5383_v56 = vld [vmem:[#allocation15 + $0x10] ss:$8 sps:$4 sm:$0xff]  }
 0x3d0   :  { %4009 = vmatprep.subr.bf16.mxu0 %v5385_v20 }
 0x3d3   :  { %4010 = vmatpush1.bf16.msra.mxu0 %v5383_v56 }
 0x4a1   :  { %v3344_v11 = vpop.f32.mrb[8].mxu0 }
 0x4a2   :  { %v4622_v23 = vadd.f32 %v3344_v11, %v2942_v21  ;;  %v3346_v24 = vpop.f32.mrb[9].mxu0  ;;  %v5388_v21 = vld [vmem:[#allocation15 + $0x24] ss:$8 sps:$4 sm:$0xff]   ;;  %v5391_v11 = vld [vmem:[#allocation15 + $0x34] ss:$8 sps:$4 sm:$0xff]  }
 0x4a3   :  { %v4623_v25 = vadd.f32 %v3346_v24, %v2946_v22  ;;  %v3348_v26 = vpop.f32.mrb[10].mxu0  ;;  %v5386_v22 = vld [vmem:[#allocation15 + $0x20] ss:$8 sps:$4 sm:$0xff]   ;;  %4011 = vmatprep.subr.bf16.mxu0 %v5388_v21  ;;  %v5394_v24 = vld [vmem:[#allocation15 + $0x44] ss:$8 sps:$4 sm:$0xff]  }
 0x4a4   :  { %v3351_v27 = vmax.f32 %v4622_v23, 0.0  ;;  %v3349_v28 = vpop.f32.mrb[11].mxu0  ;;  %4012 = vmatpush1.bf16.msra.mxu0 %v5386_v22  ;;  %v5389_v23 = vld [vmem:[#allocation15 + $0x30] ss:$8 sps:$4 sm:$0xff]   ;;  %v5397_v26 = vld [vmem:[#allocation15 + $0x54] ss:$8 sps:$4 sm:$0xff]  }
 0x4a5   :  { %v3352_v29 = vmax.f32 %v4623_v25, 0.0  ;;  %4013 = vmatprep.subr.bf16.mxu0 %v5391_v11  ;;  %v5392_v25 = vld [vmem:[#allocation15 + $0x40] ss:$8 sps:$4 sm:$0xff]   ;;  %v5400_v28 = vld [vmem:[#allocation15 + $0x64] ss:$8 sps:$4 sm:$0xff]  }
 0x4a6   :  { %v3353_v32 = vpack.c.bf16 %v3351_v27, %v3351_v27  ;;  %v5395_v27 = vld [vmem:[#allocation15 + $0x50] ss:$8 sps:$4 sm:$0xff]  }
 0x4a7   :  { %v3354_v30 = vpack.c.bf16 %v3352_v29, %v3352_v29  ;;  %v5398_v29 = vld [vmem:[#allocation15 + $0x60] ss:$8 sps:$4 sm:$0xff]  }
 0x4a8   :  { %4014 = vmatpush1.bf16.msra.mxu0 %v5389_v23 }
 0x4a9   :  { %3591 = vmatprep.mubr.bf16.mxu1 %v3354_v30  ;;  %4015 = vmatprep.subr.bf16.mxu0 %v5394_v24  ;;  %v5403_v30 = vld [vmem:[#allocation15 + $0x74] ss:$8 sps:$4 sm:$0xff]  }
 0x4aa   :  { %3592 = vmatmul.mubr.bf16.vlgmr.msra.gmra.mrb[8].mxu1 %v3353_v32  ;;  %v4537_v32 = vld [vmem:[%s6051_s13] ss:$0 sm:$0xff] }
 0x4ab   :  { %4564 = vmatpush3.bf16.msra.mxu1 %v5357_v31  ;;  %v5401_v31 = vld [vmem:[#allocation15 + $0x70] ss:$8 sps:$4 sm:$0xff]  }
 0x4ac   :  { %4565 = vmatprep.subr.bf16.mxu1 %v5358_v33  ;;  %4016 = vmatpush1.bf16.msra.mxu0 %v5392_v25 }
 0x4ad   :  { %4017 = vmatprep.subr.bf16.mxu0 %v5397_v26 }
 0x4af   :  { %4566 = vmatpush3.bf16.msra.mxu1 %v5359_v34 }
 0x4b0   :  { %4567 = vmatprep.subr.bf16.mxu1 %v5360_v35  ;;  %4018 = vmatpush1.bf16.msra.mxu0 %v5395_v27 }
 0x4b1   :  { %4019 = vmatprep.subr.bf16.mxu0 %v5400_v28 }
 0x4b3   :  { %4568 = vmatpush3.bf16.msra.mxu1 %v5361_v36 }
 0x4b4   :  { %4569 = vmatprep.subr.bf16.mxu1 %v5362_v37  ;;  %4020 = vmatpush1.bf16.msra.mxu0 %v5398_v29 }
 0x4b5   :  { %4021 = vmatprep.subr.bf16.mxu0 %v5403_v30 }
 0x4b7   :  { %4570 = vmatpush3.bf16.msra.mxu1 %v5363_v38 }
 0x4b8   :  { %4571 = vmatprep.subr.bf16.mxu1 %v5364_v39  ;;  %4022 = vmatpush1.bf16.msra.mxu0 %v5401_v31 }
 0x4bb   :  { %4572 = vmatpush3.bf16.msra.mxu1 %v5365_v40 }
 0x4bc   :  { %4573 = vmatprep.subr.bf16.mxu1 %v5366_v51 }
 0x4bf   :  { %4574 = vmatpush3.bf16.msra.mxu1 %v5367_v41 }
 0x4c0   :  { %4575 = vmatprep.subr.bf16.mxu1 %v5368_v42  ;;  %v3915_v42 = vld [vmem:[#allocation16] sm:$0x3] }
 0x4c3   :  { %4576 = vmatpush3.bf16.msra.mxu1 %v5369_v43  ;;  %v3924_v43 = vrot.slane %v3915_v42, %v5915_v50 }
 0x4c4   :  { %4577 = vmatprep.subr.bf16.mxu1 %v5370_v44 }
 0x4c7   :  { %4578 = vmatpush3.bf16.msra.mxu1 %v5371_v45 }
 0x4c8   :  { %4594 = vmatprep.subr.bf16.mxu1 %v5657_v46 }
 0x57d   :  { %v3593_v55 = vpop.f32.mrb[8].mxu1 }
 0x57e   :  { %v3594_v57 = vadd.f32 %v3593_v55, %v3392_v53  ;;  %v3595_v58 = vpop.f32.mrb[9].mxu1 }
 0x57f   :  { %v3596_v59 = vadd.f32 %v3595_v58, %v3396_v54  ;;  %v3597_v60 = vpop.f32.mrb[10].mxu1  ;;  %v4048_v58 = vld [vmem:[%s6039_s1] sm:$0xff] }
 0x580   :  { %v3600_v61 = vmax.f32 %v3594_v57, 0.0  ;;  %v3598_v62 = vpop.f32.mrb[11].mxu1  ;;  %v3920_v57 = vrot.slane %v3915_v42, %v5910_v48 }
 0x581   :  { %v3601_v63 = vmax.f32 %v3596_v59, 0.0 }
 0x582   :  { %v3602_v3 = vpack.c.bf16 %v3600_v61, %v3600_v61 }
 0x583   :  { %v3603_v0 = vpack.c.bf16 %v3601_v63, %v3601_v63 }
 0x585   :  { %3771 = vmatprep.mubr.bf16.mxu1 %v3603_v0 }
 0x586   :  { %3772 = vmatmul.mubr.bf16.vlgmr.msra.gmra.mrb[12].mxu1 %v3602_v3 }
 0x587   :  { %4595 = vmatpush3.bf16.msra.mxu1 %v5372_v2  ;;  %4610 = vmatprep.mubr.msk.bf16.mxu1 %vm5658_vm0, %v5657_v46 }
 0x588   :  { %4596 = vmatprep.subr.bf16.mxu1 %v5657_v46 }
 0x58b   :  { %4597 = vmatpush3.bf16.msra.mxu1 %v5373_v4 }
 0x58c   :  { %4598 = vmatprep.subr.bf16.mxu1 %v5657_v46 }
 0x58f   :  { %4599 = vmatpush3.bf16.msra.mxu1 %v5374_v5 }
 0x590   :  { %4600 = vmatprep.subr.bf16.mxu1 %v5657_v46 }
 0x593   :  { %4601 = vmatpush3.bf16.msra.mxu1 %v5375_v6 }
 0x594   :  { %4602 = vmatprep.subr.bf16.mxu1 %v5657_v46 }
 0x597   :  { %4603 = vmatpush3.bf16.msra.mxu1 %v5376_v7 }
 0x598   :  { %4604 = vmatprep.subr.bf16.mxu1 %v5657_v46 }
 0x59b   :  { %4605 = vmatpush3.bf16.msra.mxu1 %v5377_v8 }
 0x59c   :  { %4606 = vmatprep.subr.bf16.mxu1 %v5657_v46 }
 0x59f   :  { %4607 = vmatpush3.bf16.msra.mxu1 %v5378_v9 }
 0x5a0   :  { %4608 = vmatprep.subr.bf16.mxu1 %v5657_v46 }
 0x5a3   :  { %4609 = vmatpush3.bf16.msra.mxu1 %v5379_v10 }
 0x659   :  { %v4579_v14 = vpop.f32.mrb[12].mxu1 }
 0x65a   :  { %v4580_v16 = vpop.f32.mrb[13].mxu1 }
 0x65b   :  { %v4581_v17 = vadd.f32 %v4580_v16, %v4579_v14  ;;  %v4582_v49 = vpop.f32.mrb[14].mxu1 }
 0x65c   :  { %v4583_v47 = vpop.f32.mrb[15].mxu1 }
 0x65d   :  { %v3774_v18 = vadd.f32 %v4581_v17, %v4520_v15 }
 0x65f   :  { %v3779_v1 = vmax.f32 %v3774_v18, 0.0 }
 0x661   :  { %v3780_v19 = vpack.c.bf16 %v3779_v1, %v3779_v1 }
 0x663   :  { %4611 = vmatmul.mubr.bf16.vlgmr.msra.gmra.mrb[16].mxu1 %v3780_v19 }
 0x736   :  { %v3886_v33 = vpop.f32.mrb[16].mxu1 }
 0x737   :  { %v3887_v34 = vadd.f32 %v4537_v32, %v3886_v33  ;;  %v4612_v35 = vpop.f32.mrb[17].mxu1 }
 0x738   :  { %v3889_v36 = vpop.f32.mrb[18].mxu1 }
 0x739   :  { %v4546_v37 = vmul.f32 -1.442695, %v3887_v34  ;;  %v4613_v38 = vpop.f32.mrb[19].mxu1 }
 0x73b   :  { %5404 = vpow2.f32 %v4546_v37 }
 0x745   :  { %v5405_v39 = vpop.eup %5404 }
 0x746   :  { %v3895_v40 = vadd.f32 1.0, %v5405_v39 }
 0x748   :  { %5406 = vrcp.f32 %v3895_v40 }
 0x752   :  { %v5407_v51 = vpop.eup %5406 }
 0x753   :  { %v3898_v41 = vpack.c.bf16 %v5407_v51, %v5407_v51 }
 0x755   :  { %4040 = vmatmul.mubr.bf16.vlgmr.msra.gmra.mrb[12].mxu0 %v3898_v41 }
 0x828   :  { %v4041_v44 = vpop.f32.mrb[12].mxu0 }
 0x829   :  { %v4043_v45 = vpop.f32.mrb[13].mxu0  ;;  %v4042_v60 = vadd.f32 %v4041_v44, %v3920_v57 }
 0x82a   :  { %v4044_v46 = vadd.f32 %v4043_v45, %v3924_v43  ;;  %v4045_v52 = vpop.f32.mrb[14].mxu0 }
 0x82b   :  { %v4046_v53 = vpop.f32.mrb[15].mxu0 }
 0x82c   :  { %v4049_v54 = vmul.f32 0.5, %v4044_v46 }
 0x82e   :  { %v4050_v55 = vmul.f32 1.442695, %v4049_v54 }
 0x830   :  { %5408 = vpow2.f32 %v4050_v55 }
 0x83a   :  { %v5409_v59 = vpop.eup %5408 }
 0x83b   :  { %v4052_v61 = vmul.f32 %v5409_v59, %v4048_v58 }
 0x83d   :  { %v4053_v62 = vadd.f32 %v4052_v61, %v4042_v60 }
 0x83f   :  { %4054 = vst [vmem:[%s6054_s16] sm:$0xff] %v4053_v62 }
 0x840   :  { %4059 = vsyncpa [#allocation3], 1 }
 0x841   :  { %4060 = vsyncpa [#allocation5], 1 }
 0x842   :  { %4061 = vsyncpa [#allocation8], 1 }
 0x843   :  { %4062 = vsyncpa [#allocation11], 1 }
 0x844   :  { %4063 = vsyncpa [#allocation14], 1 }
 0x845   :  { %4064 = vsyncpa [#allocation17], 1 }

</bundles_post_ra>
